<compile_context>
chip_gen: v7x
topology: tpu7x:2x2x1
jax: 0.10.0
libtpu: 0.0.40
codegen_flags: <defaults>
</compile_context>

<pallas_src>
import functools

import jax
import jax.numpy as jnp
from jax import lax
from jax.experimental import pallas as pl
from jax.experimental.pallas import tpu as pltpu


def _round_up(x, m):
    return ((x + m - 1) // m) * m


def _query_and_group_kernel(tri_ref, q_rm_ref, center_ref, points_ref, out_ref, *,
                            radius, nsample, group):
    # tri_ref    : (NC, NC) bf16  strictly-lower-triangular ones (hoisted, constant)
    # q_rm_ref   : (1, TP, 3)     query centers, row-major (distance compute)
    # center_ref : (1, 3+C, TP)   query centers channel-major, zero-padded on features
    # points_ref : (1, 3+C, N)    [xyz ; features], channel-major (lane-dense along N)
    # out_ref    : (1, nsample, 3+C, TP)
    nc = tri_ref.shape[0]
    n_pad = points_ref.shape[2]
    tp = center_ref.shape[2]
    n_chunks = n_pad // nc

    pts = points_ref[0].astype(jnp.float32)        # (3+C, N)
    q_rm = q_rm_ref[0].astype(jnp.float32)         # (TP, 3)
    center = center_ref[0].astype(jnp.float32)     # (3+C, TP)

    r2 = jnp.float32(radius * radius)

    # Squared distances, coordinate-by-coordinate on the VPU (exact same
    # arithmetic as the CUDA kernel).  Computed query-major so the coordinate
    # rows come straight out of points_ref[:3] -- no separate row-major xyz
    # input and no transposed copy of the point cloud.
    d2t = jnp.zeros((tp, n_pad), jnp.float32)
    for d in range(3):
        diff = q_rm[:, d:d + 1] - pts[d:d + 1, :]                  # (TP, N)
        d2t = d2t + diff * diff
    maskf_t = (d2t < r2).astype(jnp.float32)                       # (TP, N), 0/1
    # Single aligned f32 relayout to the point-major orientation used by the
    # prefix count and gather matmuls (both dims are multiples of 8).
    maskf = maskf_t.T                                              # (N, TP)

    # Exclusive running count of in-ball points along N per query column,
    # chunk-by-chunk:  cnt_excl[k, p] = #{ j < k : in ball }.  The bf16
    # strictly-lower-triangular chunk matmul with f32 accumulation is exact on
    # 0/1 operands; `carry` adds the totals of all earlier chunks.
    carry = jnp.zeros((1, tp), jnp.float32)
    chunks = []
    for c in range(n_chunks):
        m_c = maskf[c * nc:(c + 1) * nc, :]                        # (NC, TP)
        part = jnp.dot(tri_ref[...], m_c.astype(jnp.bfloat16),
                       preferred_element_type=jnp.float32)         # (NC, TP)
        chunks.append(part + carry)
        carry = carry + jnp.sum(m_c, axis=0, keepdims=True)
    cnt_excl = chunks[0] if n_chunks == 1 else jnp.concatenate(chunks, axis=0)
    cnt = carry                                                    # (1, TP) total in-ball count
    # TODO(synk): for very large N move this unrolled chunk loop into a
    # lax.fori_loop writing cnt_excl into a VMEM scratch buffer.

    # Hoisted fallback selectors (computed once, reused by every slot):
    #   first_f : one-hot of the first in-ball point per query (pad source)
    #   empty_f : one-hot of point 0 for queries whose ball is empty
    first_f = jnp.where(cnt_excl == 0.0, maskf, 0.0)               # (N, TP)
    row0 = (lax.broadcasted_iota(jnp.int32, (n_pad, 1), 0) == 0).astype(jnp.float32)
    empty_f = row0 * (cnt == 0.0).astype(jnp.float32)              # (N, TP)
    pad_src = first_f + empty_f                                    # exactly one-hot per column

    # Gather `group` sample slots per MXU matmul: the per-slot one-hot
    # selection matrices are concatenated along the (128-aligned) query axis so
    # the RHS is (N, group*TP) wide and the result stays lane-dense.
    for s0 in range(0, nsample, group):
        g_sz = min(group, nsample - s0)
        sels = []
        for i in range(g_sz):
            s_f = jnp.float32(s0 + i)
            hit = jnp.where(cnt_excl == s_f, maskf, 0.0)           # s-th in-ball point
            pad_gate = (cnt <= s_f).astype(jnp.float32)            # (1, TP)
            sels.append(hit + pad_gate * pad_src)                  # exactly one-hot per column
        sel = sels[0] if g_sz == 1 else jnp.concatenate(sels, axis=1)   # (N, g_sz*TP)
        gathered = jnp.dot(pts, sel,
                           preferred_element_type=jnp.float32)     # (3+C, g_sz*TP)
        for i in range(g_sz):
            out_ref[0, s0 + i] = (gathered[:, i * tp:(i + 1) * tp]
                                  - center).astype(out_ref.dtype)


def query_and_group(radius, nsample, xyz, new_xyz, features=None, *, max_chunk=512):
    """Pallas TPU implementation of pointnet++ QueryAndGroup.forward.

    xyz:      (B, N, 3) point coordinates
    new_xyz:  (B, npoint, 3) ball-query centers
    features: (B, N, C) point descriptors or None
    returns:  (B, 3 + C, npoint, nsample)
    """
    B, N, _ = xyz.shape
    npoint = new_xyz.shape[1]
    C = 0 if features is None else features.shape[2]
    ch = 3 + C

    # --- pad the point axis to a multiple of the prefix-count chunk size ---
    nc = _round_up(min(N, int(max_chunk)), 8)
    n_pad = _round_up(N, nc)
    if n_pad != N:
        # far-away dummy points: never inside any query ball, never gathered
        xyz = jnp.concatenate(
            [xyz, jnp.full((B, n_pad - N, 3), 1e9, xyz.dtype)], axis=1)
        if features is not None:
            features = jnp.concatenate(
                [features, jnp.zeros((B, n_pad - N, C), features.dtype)], axis=1)

    # --- pad the query axis to a multiple of the query tile ---
    if npoint >= 128:
        tp = 128
        p_pad = _round_up(npoint, tp)
    else:
        tp = _round_up(npoint, 8)
        p_pad = tp
    if p_pad != npoint:
        new_xyz = jnp.concatenate(
            [new_xyz, jnp.zeros((B, p_pad - npoint, 3), new_xyz.dtype)], axis=1)

    # Channel-major gather source (lane-dense along N), built with plain XLA.
    xyz_t = jnp.swapaxes(xyz, 1, 2)                                # (B, 3, n_pad)
    if features is None:
        points_cn = xyz_t
    else:
        points_cn = jnp.concatenate(
            [xyz_t, jnp.swapaxes(features, 1, 2)], axis=1)         # (B, 3+C, n_pad)
    out_dtype = points_cn.dtype

    # Channel-major centers zero-padded on the feature channels (only xyz gets
    # the relative-coordinate subtraction); built in XLA so the kernel does no
    # sublane-unaligned concatenation.
    new_xyz_cm = jnp.swapaxes(new_xyz, 1, 2)                       # (B, 3, p_pad)
    if C > 0:
        center_cn = jnp.concatenate(
            [new_xyz_cm, jnp.zeros((B, C, p_pad), new_xyz.dtype)], axis=1)
    else:
        center_cn = new_xyz_cm                                     # (B, 3+C, p_pad)

    # Hoisted strictly-lower-triangular chunk mask (bf16): DMA'd once and kept
    # resident across grid steps via a constant index_map.
    rows = lax.broadcasted_iota(jnp.int32, (nc, nc), 0)
    cols = lax.broadcasted_iota(jnp.int32, (nc, nc), 1)
    tri = (cols < rows).astype(jnp.bfloat16)

    # Batch `group` sample slots per gather matmul (RHS width ~512 lanes), only
    # when the query tile is 128-aligned so the lane concatenation is aligned.
    group = min(int(nsample), max(1, 512 // tp)) if tp % 128 == 0 else 1

    kernel = functools.partial(_query_and_group_kernel,
                               radius=float(radius), nsample=int(nsample),
                               group=group)

    grid = (B, p_pad // tp)
    out_raw = pl.pallas_call(
        kernel,
        out_shape=jax.ShapeDtypeStruct((B, int(nsample), ch, p_pad), out_dtype),
        grid_spec=pltpu.PrefetchScalarGridSpec(
            num_scalar_prefetch=0,
            grid=grid,
            in_specs=[
                pl.BlockSpec((nc, nc), lambda b, p: (0, 0)),        # triangle (constant)
                pl.BlockSpec((1, tp, 3), lambda b, p: (b, p, 0)),   # centers, row-major
                pl.BlockSpec((1, ch, tp), lambda b, p: (b, 0, p)),  # centers, channel-major
                pl.BlockSpec((1, ch, n_pad), lambda b, p: (b, 0, 0)),  # points, channel-major
            ],
            out_specs=pl.BlockSpec((1, int(nsample), ch, tp),
                                   lambda b, p: (b, 0, 0, p)),
        ),
        compiler_params=pltpu.CompilerParams(
            dimension_semantics=("parallel", "parallel"),
            vmem_limit_bytes=64 * 1024 * 1024),
    )(tri, new_xyz, center_cn, points_cn)

    # Kernel emits (B, nsample, 3+C, npoint) so every in-kernel store is a dense
    # (3+C, TP) lane-major tile; permute to the PyTorch layout outside.
    # TODO(synk): consumers that can take the raw layout should skip this
    # full-output transpose (it is one extra HBM round trip of the output).
    return jnp.transpose(out_raw[..., :npoint], (0, 2, 3, 1))      # (B, 3+C, npoint, nsample)


def _reference_numpy(radius, nsample, xyz, new_xyz, features):
    """Direct re-implementation of the CUDA ball_query + group_points path."""
    import numpy as np
    B, N, _ = xyz.shape
    P = new_xyz.shape[1]
    C = 0 if features is None else features.shape[2]
    out = np.zeros((B, 3 + C, P, nsample), dtype=np.float32)
    r2 = radius * radius
    for b in range(B):
        for p in range(P):
            q = new_xyz[b, p]
            idx = np.zeros((nsample,), dtype=np.int64)
            cnt = 0
            for k in range(N):
                d2 = float(np.sum((xyz[b, k] - q) ** 2))
                if d2 < r2:
                    if cnt == 0:
                        idx[:] = k
                    idx[cnt] = k
                    cnt += 1
                    if cnt >= nsample:
                        break
            out[b, :3, p, :] = xyz[b, idx, :].T - q[:, None]
            if C > 0:
                out[b, 3:, p, :] = features[b, idx, :].T
    return out


if __name__ == "__main__":
    import numpy as np

    key = jax.random.PRNGKey(0)
    k1, k2, k3 = jax.random.split(key, 3)

    B, N, C = 2, 64, 4
    npoint, nsample, radius = 128, 8, 1.5

    xyz = jax.random.normal(k1, (B, N, 3), dtype=jnp.float32)
    features = jax.random.normal(k2, (B, N, C), dtype=jnp.float32)
    # Centers: mostly random (mix of full, partially-filled balls) plus a few
    # far-away centers per batch (empty ball -> index-0 fallback).
    centers = jax.random.normal(k3, (B, npoint, 3), dtype=jnp.float32) * 1.2
    far = jnp.full((B, 4, 3), 10.0, dtype=jnp.float32)
    new_xyz = jnp.concatenate([centers[:, :-4, :], far], axis=1)   # (B, npoint, 3)

    out = jax.block_until_ready(
        query_and_group(radius, nsample, xyz, new_xyz, features))
    assert out.shape == (B, 3 + C, npoint, nsample)
    ref = _reference_numpy(radius, nsample, np.asarray(xyz),
                           np.asarray(new_xyz), np.asarray(features))
    np.testing.assert_allclose(np.asarray(out), ref, rtol=1e-5, atol=1e-5)

    # Exercise the multi-chunk prefix-count path (2 chunks of 32 points).
    out_chunked = jax.block_until_ready(
        query_and_group(radius, nsample, xyz, new_xyz, features, max_chunk=32))
    np.testing.assert_allclose(np.asarray(out_chunked), ref, rtol=1e-5, atol=1e-5)

    # No-feature path + non-multiple-of-tile npoint (exercises query padding).
    npoint2 = 10
    new_xyz2 = new_xyz[:, :npoint2, :]
    out_nf = jax.block_until_ready(
        query_and_group(radius, nsample, xyz, new_xyz2, None))
    assert out_nf.shape == (B, 3, npoint2, nsample)
    ref_nf = _reference_numpy(radius, nsample, np.asarray(xyz),
                              np.asarray(new_xyz2), None)
    np.testing.assert_allclose(np.asarray(out_nf), ref_nf, rtol=1e-5, atol=1e-5)

    print("KERNEL_OK")
</pallas_src>

<mosaic_0001>
module attributes {stable_mosaic.version = 11 : i64} {
  func.func @_query_and_group_kernel(%arg0: i32, %arg1: i32, %arg2: memref<64x64xbf16, #tpu.memory_space<vmem>>, %arg3: memref<1x128x3xf32, #tpu.memory_space<vmem>>, %arg4: memref<1x7x128xf32, #tpu.memory_space<vmem>>, %arg5: memref<1x7x64xf32, #tpu.memory_space<vmem>>, %arg6: memref<1x8x7x128xf32, #tpu.memory_space<vmem>>) attributes {dimension_semantics = [#tpu.dimension_semantics<parallel>, #tpu.dimension_semantics<parallel>], iteration_bounds = array<i64: 2, 1>, scalar_prefetch = 0 : i64, scratch_operands = 0 : i64, tpu.core_type = #tpu.core_type<tc>, window_params = [{pipeline_mode = #tpu.pipeline_mode<synchronous>, transform_indices = @transform_0, window_bounds = array<i64: 64, 64>}, {transform_indices = @transform_1, window_bounds = array<i64: 1, 128, 3>}, {transform_indices = @transform_2, window_bounds = array<i64: 1, 7, 128>}, {transform_indices = @transform_3, window_bounds = array<i64: 1, 7, 64>}, {transform_indices = @transform_4, window_bounds = array<i64: 1, 8, 7, 128>}]} {
    %c0 = arith.constant 0 : index
    %c0_0 = arith.constant 0 : index
    %c0_1 = arith.constant 0 : index
    %0 = vector.load %arg5[%c0, %c0_0, %c0_1] : memref<1x7x64xf32, #tpu.memory_space<vmem>>, vector<1x7x64xf32>
    %1 = vector.shape_cast %0 : vector<1x7x64xf32> to vector<7x64xf32>
    %c0_2 = arith.constant 0 : index
    %c0_3 = arith.constant 0 : index
    %c0_4 = arith.constant 0 : index
    %2 = vector.load %arg3[%c0_2, %c0_3, %c0_4] : memref<1x128x3xf32, #tpu.memory_space<vmem>>, vector<1x128x3xf32>
    %3 = vector.shape_cast %2 : vector<1x128x3xf32> to vector<128x3xf32>
    %c0_5 = arith.constant 0 : index
    %c0_6 = arith.constant 0 : index
    %c0_7 = arith.constant 0 : index
    %4 = vector.load %arg4[%c0_5, %c0_6, %c0_7] : memref<1x7x128xf32, #tpu.memory_space<vmem>>, vector<1x7x128xf32>
    %5 = vector.shape_cast %4 : vector<1x7x128xf32> to vector<7x128xf32>
    %cst = arith.constant 0.000000e+00 : f32
    %6 = vector.broadcast %cst : f32 to vector<128x64xf32>
    %7 = vector.extract_strided_slice %3 {offsets = [0, 0], sizes = [128, 1], strides = [1, 1]} : vector<128x3xf32> to vector<128x1xf32>
    %8 = vector.extract_strided_slice %1 {offsets = [0, 0], sizes = [1, 64], strides = [1, 1]} : vector<7x64xf32> to vector<1x64xf32>
    %9 = vector.broadcast %7 : vector<128x1xf32> to vector<128x64xf32>
    %10 = vector.broadcast %8 : vector<1x64xf32> to vector<128x64xf32>
    %11 = arith.subf %9, %10 : vector<128x64xf32>
    %12 = arith.mulf %11, %11 : vector<128x64xf32>
    %13 = arith.addf %6, %12 : vector<128x64xf32>
    %14 = vector.extract_strided_slice %3 {offsets = [0, 1], sizes = [128, 1], strides = [1, 1]} : vector<128x3xf32> to vector<128x1xf32>
    %15 = vector.extract_strided_slice %1 {offsets = [1, 0], sizes = [1, 64], strides = [1, 1]} : vector<7x64xf32> to vector<1x64xf32>
    %16 = vector.broadcast %14 : vector<128x1xf32> to vector<128x64xf32>
    %17 = vector.broadcast %15 : vector<1x64xf32> to vector<128x64xf32>
    %18 = arith.subf %16, %17 : vector<128x64xf32>
    %19 = arith.mulf %18, %18 : vector<128x64xf32>
    %20 = arith.addf %13, %19 : vector<128x64xf32>
    %21 = vector.extract_strided_slice %3 {offsets = [0, 2], sizes = [128, 1], strides = [1, 1]} : vector<128x3xf32> to vector<128x1xf32>
    %22 = vector.extract_strided_slice %1 {offsets = [2, 0], sizes = [1, 64], strides = [1, 1]} : vector<7x64xf32> to vector<1x64xf32>
    %23 = vector.broadcast %21 : vector<128x1xf32> to vector<128x64xf32>
    %24 = vector.broadcast %22 : vector<1x64xf32> to vector<128x64xf32>
    %25 = arith.subf %23, %24 : vector<128x64xf32>
    %26 = arith.mulf %25, %25 : vector<128x64xf32>
    %27 = arith.addf %20, %26 : vector<128x64xf32>
    %cst_8 = arith.constant 2.250000e+00 : f32
    %28 = vector.broadcast %cst_8 : f32 to vector<128x64xf32>
    %29 = arith.cmpf olt, %27, %28 : vector<128x64xf32>
    %30 = arith.extui %29 : vector<128x64xi1> to vector<128x64xi32>
    %31 = arith.sitofp %30 : vector<128x64xi32> to vector<128x64xf32>
    %32 = tpu.transpose %31, [1, 0] : vector<128x64xf32> -> vector<64x128xf32>
    %cst_9 = arith.constant 0.000000e+00 : f32
    %33 = vector.broadcast %cst_9 : f32 to vector<1x128xf32>
    %c0_10 = arith.constant 0 : index
    %c0_11 = arith.constant 0 : index
    %34 = vector.load %arg2[%c0_10, %c0_11] : memref<64x64xbf16, #tpu.memory_space<vmem>>, vector<64x64xbf16>
    %35 = arith.truncf %32 : vector<64x128xf32> to vector<64x128xbf16>
    %cst_12 = arith.constant dense<0.000000e+00> : vector<64x128xf32>
    %36 = tpu.matmul %34, %35, %cst_12 {dimension_numbers = #tpu.dot_dimension_numbers<[1], [0], [0], [1], [0, 0, 1, 1], [], []>} : vector<64x64xbf16>, vector<64x128xbf16>, vector<64x128xf32> -> vector<64x128xf32>
    %37 = vector.broadcast %33 : vector<1x128xf32> to vector<64x128xf32>
    %38 = arith.addf %36, %37 : vector<64x128xf32>
    %cst_13 = arith.constant dense<0.000000e+00> : vector<128xf32>
    %39 = vector.multi_reduction <add>, %32, %cst_13 [0] : vector<64x128xf32> to vector<128xf32>
    %40 = vector.shape_cast %39 : vector<128xf32> to vector<1x128xf32>
    %41 = arith.addf %33, %40 : vector<1x128xf32>
    %cst_14 = arith.constant 0.000000e+00 : f32
    %42 = vector.broadcast %cst_14 : f32 to vector<64x128xf32>
    %43 = arith.cmpf oeq, %38, %42 : vector<64x128xf32>
    %cst_15 = arith.constant 0.000000e+00 : f32
    %44 = vector.broadcast %cst_15 : f32 to vector<64x128xf32>
    %45 = arith.select %43, %32, %44 : vector<64x128xi1>, vector<64x128xf32>
    %46 = tpu.iota {dimensions = array<i32: 0>} : vector<64x1xi32>
    %c0_i32 = arith.constant 0 : i32
    %47 = vector.broadcast %c0_i32 : i32 to vector<64x1xi32>
    %48 = arith.cmpi eq, %46, %47 : vector<64x1xi32>
    %49 = arith.extui %48 : vector<64x1xi1> to vector<64x1xi32>
    %50 = arith.sitofp %49 : vector<64x1xi32> to vector<64x1xf32>
    %cst_16 = arith.constant 0.000000e+00 : f32
    %51 = vector.broadcast %cst_16 : f32 to vector<1x128xf32>
    %52 = arith.cmpf oeq, %41, %51 : vector<1x128xf32>
    %53 = arith.extui %52 : vector<1x128xi1> to vector<1x128xi32>
    %54 = arith.sitofp %53 : vector<1x128xi32> to vector<1x128xf32>
    %55 = vector.broadcast %50 : vector<64x1xf32> to vector<64x128xf32>
    %56 = vector.broadcast %54 : vector<1x128xf32> to vector<64x128xf32>
    %57 = arith.mulf %55, %56 : vector<64x128xf32>
    %58 = arith.addf %45, %57 : vector<64x128xf32>
    %cst_17 = arith.constant 0.000000e+00 : f32
    %59 = vector.broadcast %cst_17 : f32 to vector<64x128xf32>
    %60 = arith.cmpf oeq, %38, %59 : vector<64x128xf32>
    %cst_18 = arith.constant 0.000000e+00 : f32
    %61 = vector.broadcast %cst_18 : f32 to vector<64x128xf32>
    %62 = arith.select %60, %32, %61 : vector<64x128xi1>, vector<64x128xf32>
    %cst_19 = arith.constant 0.000000e+00 : f32
    %63 = vector.broadcast %cst_19 : f32 to vector<1x128xf32>
    %64 = arith.cmpf ole, %41, %63 : vector<1x128xf32>
    %65 = arith.extui %64 : vector<1x128xi1> to vector<1x128xi32>
    %66 = arith.sitofp %65 : vector<1x128xi32> to vector<1x128xf32>
    %67 = vector.broadcast %66 : vector<1x128xf32> to vector<64x128xf32>
    %68 = arith.mulf %67, %58 : vector<64x128xf32>
    %69 = arith.addf %62, %68 : vector<64x128xf32>
    %cst_20 = arith.constant 1.000000e+00 : f32
    %70 = vector.broadcast %cst_20 : f32 to vector<64x128xf32>
    %71 = arith.cmpf oeq, %38, %70 : vector<64x128xf32>
    %cst_21 = arith.constant 0.000000e+00 : f32
    %72 = vector.broadcast %cst_21 : f32 to vector<64x128xf32>
    %73 = arith.select %71, %32, %72 : vector<64x128xi1>, vector<64x128xf32>
    %cst_22 = arith.constant 1.000000e+00 : f32
    %74 = vector.broadcast %cst_22 : f32 to vector<1x128xf32>
    %75 = arith.cmpf ole, %41, %74 : vector<1x128xf32>
    %76 = arith.extui %75 : vector<1x128xi1> to vector<1x128xi32>
    %77 = arith.sitofp %76 : vector<1x128xi32> to vector<1x128xf32>
    %78 = vector.broadcast %77 : vector<1x128xf32> to vector<64x128xf32>
    %79 = arith.mulf %78, %58 : vector<64x128xf32>
    %80 = arith.addf %73, %79 : vector<64x128xf32>
    %cst_23 = arith.constant 2.000000e+00 : f32
    %81 = vector.broadcast %cst_23 : f32 to vector<64x128xf32>
    %82 = arith.cmpf oeq, %38, %81 : vector<64x128xf32>
    %cst_24 = arith.constant 0.000000e+00 : f32
    %83 = vector.broadcast %cst_24 : f32 to vector<64x128xf32>
    %84 = arith.select %82, %32, %83 : vector<64x128xi1>, vector<64x128xf32>
    %cst_25 = arith.constant 2.000000e+00 : f32
    %85 = vector.broadcast %cst_25 : f32 to vector<1x128xf32>
    %86 = arith.cmpf ole, %41, %85 : vector<1x128xf32>
    %87 = arith.extui %86 : vector<1x128xi1> to vector<1x128xi32>
    %88 = arith.sitofp %87 : vector<1x128xi32> to vector<1x128xf32>
    %89 = vector.broadcast %88 : vector<1x128xf32> to vector<64x128xf32>
    %90 = arith.mulf %89, %58 : vector<64x128xf32>
    %91 = arith.addf %84, %90 : vector<64x128xf32>
    %cst_26 = arith.constant 3.000000e+00 : f32
    %92 = vector.broadcast %cst_26 : f32 to vector<64x128xf32>
    %93 = arith.cmpf oeq, %38, %92 : vector<64x128xf32>
    %cst_27 = arith.constant 0.000000e+00 : f32
    %94 = vector.broadcast %cst_27 : f32 to vector<64x128xf32>
    %95 = arith.select %93, %32, %94 : vector<64x128xi1>, vector<64x128xf32>
    %cst_28 = arith.constant 3.000000e+00 : f32
    %96 = vector.broadcast %cst_28 : f32 to vector<1x128xf32>
    %97 = arith.cmpf ole, %41, %96 : vector<1x128xf32>
    %98 = arith.extui %97 : vector<1x128xi1> to vector<1x128xi32>
    %99 = arith.sitofp %98 : vector<1x128xi32> to vector<1x128xf32>
    %100 = vector.broadcast %99 : vector<1x128xf32> to vector<64x128xf32>
    %101 = arith.mulf %100, %58 : vector<64x128xf32>
    %102 = arith.addf %95, %101 : vector<64x128xf32>
    %103 = tpu.concatenate %69, %80, %91, %102 in 1 : vector<64x128xf32>, vector<64x128xf32>, vector<64x128xf32>, vector<64x128xf32> -> vector<64x512xf32>
    %cst_29 = arith.constant dense<0.000000e+00> : vector<7x512xf32>
    %104 = tpu.matmul %1, %103, %cst_29 {dimension_numbers = #tpu.dot_dimension_numbers<[1], [0], [0], [1], [0, 0, 1, 1], [], []>} : vector<7x64xf32>, vector<64x512xf32>, vector<7x512xf32> -> vector<7x512xf32>
    %105 = vector.extract_strided_slice %104 {offsets = [0, 0], sizes = [7, 128], strides = [1, 1]} : vector<7x512xf32> to vector<7x128xf32>
    %106 = arith.subf %105, %5 : vector<7x128xf32>
    %c0_30 = arith.constant 0 : index
    %c0_31 = arith.constant 0 : index
    %c0_32 = arith.constant 0 : index
    %c0_33 = arith.constant 0 : index
    %107 = vector.load %arg6[%c0_30, %c0_31, %c0_32, %c0_33] : memref<1x8x7x128xf32, #tpu.memory_space<vmem>>, vector<1x1x7x128xf32>
    %108 = vector.shape_cast %107 : vector<1x1x7x128xf32> to vector<7x128xf32>
    %109 = vector.shape_cast %106 : vector<7x128xf32> to vector<1x1x7x128xf32>
    tpu.vector_store %arg6[%c0_30, %c0_31, %c0_32, %c0_33], %109 {strides = array<i32>} : memref<1x8x7x128xf32, #tpu.memory_space<vmem>>, vector<1x1x7x128xf32>,
    %110 = vector.extract_strided_slice %104 {offsets = [0, 128], sizes = [7, 128], strides = [1, 1]} : vector<7x512xf32> to vector<7x128xf32>
    %111 = arith.subf %110, %5 : vector<7x128xf32>
    %c0_34 = arith.constant 0 : index
    %c1 = arith.constant 1 : index
    %c0_35 = arith.constant 0 : index
    %c0_36 = arith.constant 0 : index
    %112 = vector.load %arg6[%c0_34, %c1, %c0_35, %c0_36] : memref<1x8x7x128xf32, #tpu.memory_space<vmem>>, vector<1x1x7x128xf32>
    %113 = vector.shape_cast %112 : vector<1x1x7x128xf32> to vector<7x128xf32>
    %114 = vector.shape_cast %111 : vector<7x128xf32> to vector<1x1x7x128xf32>
    tpu.vector_store %arg6[%c0_34, %c1, %c0_35, %c0_36], %114 {strides = array<i32>} : memref<1x8x7x128xf32, #tpu.memory_space<vmem>>, vector<1x1x7x128xf32>,
    %115 = vector.extract_strided_slice %104 {offsets = [0, 256], sizes = [7, 128], strides = [1, 1]} : vector<7x512xf32> to vector<7x128xf32>
    %116 = arith.subf %115, %5 : vector<7x128xf32>
    %c0_37 = arith.constant 0 : index
    %c2 = arith.constant 2 : index
    %c0_38 = arith.constant 0 : index
    %c0_39 = arith.constant 0 : index
    %117 = vector.load %arg6[%c0_37, %c2, %c0_38, %c0_39] : memref<1x8x7x128xf32, #tpu.memory_space<vmem>>, vector<1x1x7x128xf32>
    %118 = vector.shape_cast %117 : vector<1x1x7x128xf32> to vector<7x128xf32>
    %119 = vector.shape_cast %116 : vector<7x128xf32> to vector<1x1x7x128xf32>
    tpu.vector_store %arg6[%c0_37, %c2, %c0_38, %c0_39], %119 {strides = array<i32>} : memref<1x8x7x128xf32, #tpu.memory_space<vmem>>, vector<1x1x7x128xf32>,
    %120 = vector.extract_strided_slice %104 {offsets = [0, 384], sizes = [7, 128], strides = [1, 1]} : vector<7x512xf32> to vector<7x128xf32>
    %121 = arith.subf %120, %5 : vector<7x128xf32>
    %c0_40 = arith.constant 0 : index
    %c3 = arith.constant 3 : index
    %c0_41 = arith.constant 0 : index
    %c0_42 = arith.constant 0 : index
    %122 = vector.load %arg6[%c0_40, %c3, %c0_41, %c0_42] : memref<1x8x7x128xf32, #tpu.memory_space<vmem>>, vector<1x1x7x128xf32>
    %123 = vector.shape_cast %122 : vector<1x1x7x128xf32> to vector<7x128xf32>
    %124 = vector.shape_cast %121 : vector<7x128xf32> to vector<1x1x7x128xf32>
    tpu.vector_store %arg6[%c0_40, %c3, %c0_41, %c0_42], %124 {strides = array<i32>} : memref<1x8x7x128xf32, #tpu.memory_space<vmem>>, vector<1x1x7x128xf32>,
    %cst_43 = arith.constant 4.000000e+00 : f32
    %125 = vector.broadcast %cst_43 : f32 to vector<64x128xf32>
    %126 = arith.cmpf oeq, %38, %125 : vector<64x128xf32>
    %cst_44 = arith.constant 0.000000e+00 : f32
    %127 = vector.broadcast %cst_44 : f32 to vector<64x128xf32>
    %128 = arith.select %126, %32, %127 : vector<64x128xi1>, vector<64x128xf32>
    %cst_45 = arith.constant 4.000000e+00 : f32
    %129 = vector.broadcast %cst_45 : f32 to vector<1x128xf32>
    %130 = arith.cmpf ole, %41, %129 : vector<1x128xf32>
    %131 = arith.extui %130 : vector<1x128xi1> to vector<1x128xi32>
    %132 = arith.sitofp %131 : vector<1x128xi32> to vector<1x128xf32>
    %133 = vector.broadcast %132 : vector<1x128xf32> to vector<64x128xf32>
    %134 = arith.mulf %133, %58 : vector<64x128xf32>
    %135 = arith.addf %128, %134 : vector<64x128xf32>
    %cst_46 = arith.constant 5.000000e+00 : f32
    %136 = vector.broadcast %cst_46 : f32 to vector<64x128xf32>
    %137 = arith.cmpf oeq, %38, %136 : vector<64x128xf32>
    %cst_47 = arith.constant 0.000000e+00 : f32
    %138 = vector.broadcast %cst_47 : f32 to vector<64x128xf32>
    %139 = arith.select %137, %32, %138 : vector<64x128xi1>, vector<64x128xf32>
    %cst_48 = arith.constant 5.000000e+00 : f32
    %140 = vector.broadcast %cst_48 : f32 to vector<1x128xf32>
    %141 = arith.cmpf ole, %41, %140 : vector<1x128xf32>
    %142 = arith.extui %141 : vector<1x128xi1> to vector<1x128xi32>
    %143 = arith.sitofp %142 : vector<1x128xi32> to vector<1x128xf32>
    %144 = vector.broadcast %143 : vector<1x128xf32> to vector<64x128xf32>
    %145 = arith.mulf %144, %58 : vector<64x128xf32>
    %146 = arith.addf %139, %145 : vector<64x128xf32>
    %cst_49 = arith.constant 6.000000e+00 : f32
    %147 = vector.broadcast %cst_49 : f32 to vector<64x128xf32>
    %148 = arith.cmpf oeq, %38, %147 : vector<64x128xf32>
    %cst_50 = arith.constant 0.000000e+00 : f32
    %149 = vector.broadcast %cst_50 : f32 to vector<64x128xf32>
    %150 = arith.select %148, %32, %149 : vector<64x128xi1>, vector<64x128xf32>
    %cst_51 = arith.constant 6.000000e+00 : f32
    %151 = vector.broadcast %cst_51 : f32 to vector<1x128xf32>
    %152 = arith.cmpf ole, %41, %151 : vector<1x128xf32>
    %153 = arith.extui %152 : vector<1x128xi1> to vector<1x128xi32>
    %154 = arith.sitofp %153 : vector<1x128xi32> to vector<1x128xf32>
    %155 = vector.broadcast %154 : vector<1x128xf32> to vector<64x128xf32>
    %156 = arith.mulf %155, %58 : vector<64x128xf32>
    %157 = arith.addf %150, %156 : vector<64x128xf32>
    %cst_52 = arith.constant 7.000000e+00 : f32
    %158 = vector.broadcast %cst_52 : f32 to vector<64x128xf32>
    %159 = arith.cmpf oeq, %38, %158 : vector<64x128xf32>
    %cst_53 = arith.constant 0.000000e+00 : f32
    %160 = vector.broadcast %cst_53 : f32 to vector<64x128xf32>
    %161 = arith.select %159, %32, %160 : vector<64x128xi1>, vector<64x128xf32>
    %cst_54 = arith.constant 7.000000e+00 : f32
    %162 = vector.broadcast %cst_54 : f32 to vector<1x128xf32>
    %163 = arith.cmpf ole, %41, %162 : vector<1x128xf32>
    %164 = arith.extui %163 : vector<1x128xi1> to vector<1x128xi32>
    %165 = arith.sitofp %164 : vector<1x128xi32> to vector<1x128xf32>
    %166 = vector.broadcast %165 : vector<1x128xf32> to vector<64x128xf32>
    %167 = arith.mulf %166, %58 : vector<64x128xf32>
    %168 = arith.addf %161, %167 : vector<64x128xf32>
    %169 = tpu.concatenate %135, %146, %157, %168 in 1 : vector<64x128xf32>, vector<64x128xf32>, vector<64x128xf32>, vector<64x128xf32> -> vector<64x512xf32>
    %cst_55 = arith.constant dense<0.000000e+00> : vector<7x512xf32>
    %170 = tpu.matmul %1, %169, %cst_55 {dimension_numbers = #tpu.dot_dimension_numbers<[1], [0], [0], [1], [0, 0, 1, 1], [], []>} : vector<7x64xf32>, vector<64x512xf32>, vector<7x512xf32> -> vector<7x512xf32>
    %171 = vector.extract_strided_slice %170 {offsets = [0, 0], sizes = [7, 128], strides = [1, 1]} : vector<7x512xf32> to vector<7x128xf32>
    %172 = arith.subf %171, %5 : vector<7x128xf32>
    %c0_56 = arith.constant 0 : index
    %c4 = arith.constant 4 : index
    %c0_57 = arith.constant 0 : index
    %c0_58 = arith.constant 0 : index
    %173 = vector.load %arg6[%c0_56, %c4, %c0_57, %c0_58] : memref<1x8x7x128xf32, #tpu.memory_space<vmem>>, vector<1x1x7x128xf32>
    %174 = vector.shape_cast %173 : vector<1x1x7x128xf32> to vector<7x128xf32>
    %175 = vector.shape_cast %172 : vector<7x128xf32> to vector<1x1x7x128xf32>
    tpu.vector_store %arg6[%c0_56, %c4, %c0_57, %c0_58], %175 {strides = array<i32>} : memref<1x8x7x128xf32, #tpu.memory_space<vmem>>, vector<1x1x7x128xf32>,
    %176 = vector.extract_strided_slice %170 {offsets = [0, 128], sizes = [7, 128], strides = [1, 1]} : vector<7x512xf32> to vector<7x128xf32>
    %177 = arith.subf %176, %5 : vector<7x128xf32>
    %c0_59 = arith.constant 0 : index
    %c5 = arith.constant 5 : index
    %c0_60 = arith.constant 0 : index
    %c0_61 = arith.constant 0 : index
    %178 = vector.load %arg6[%c0_59, %c5, %c0_60, %c0_61] : memref<1x8x7x128xf32, #tpu.memory_space<vmem>>, vector<1x1x7x128xf32>
    %179 = vector.shape_cast %178 : vector<1x1x7x128xf32> to vector<7x128xf32>
    %180 = vector.shape_cast %177 : vector<7x128xf32> to vector<1x1x7x128xf32>
    tpu.vector_store %arg6[%c0_59, %c5, %c0_60, %c0_61], %180 {strides = array<i32>} : memref<1x8x7x128xf32, #tpu.memory_space<vmem>>, vector<1x1x7x128xf32>,
    %181 = vector.extract_strided_slice %170 {offsets = [0, 256], sizes = [7, 128], strides = [1, 1]} : vector<7x512xf32> to vector<7x128xf32>
    %182 = arith.subf %181, %5 : vector<7x128xf32>
    %c0_62 = arith.constant 0 : index
    %c6 = arith.constant 6 : index
    %c0_63 = arith.constant 0 : index
    %c0_64 = arith.constant 0 : index
    %183 = vector.load %arg6[%c0_62, %c6, %c0_63, %c0_64] : memref<1x8x7x128xf32, #tpu.memory_space<vmem>>, vector<1x1x7x128xf32>
    %184 = vector.shape_cast %183 : vector<1x1x7x128xf32> to vector<7x128xf32>
    %185 = vector.shape_cast %182 : vector<7x128xf32> to vector<1x1x7x128xf32>
    tpu.vector_store %arg6[%c0_62, %c6, %c0_63, %c0_64], %185 {strides = array<i32>} : memref<1x8x7x128xf32, #tpu.memory_space<vmem>>, vector<1x1x7x128xf32>,
    %186 = vector.extract_strided_slice %170 {offsets = [0, 384], sizes = [7, 128], strides = [1, 1]} : vector<7x512xf32> to vector<7x128xf32>
    %187 = arith.subf %186, %5 : vector<7x128xf32>
    %c0_65 = arith.constant 0 : index
    %c7 = arith.constant 7 : index
    %c0_66 = arith.constant 0 : index
    %c0_67 = arith.constant 0 : index
    %188 = vector.load %arg6[%c0_65, %c7, %c0_66, %c0_67] : memref<1x8x7x128xf32, #tpu.memory_space<vmem>>, vector<1x1x7x128xf32>
    %189 = vector.shape_cast %188 : vector<1x1x7x128xf32> to vector<7x128xf32>
    %190 = vector.shape_cast %187 : vector<7x128xf32> to vector<1x1x7x128xf32>
    tpu.vector_store %arg6[%c0_65, %c7, %c0_66, %c0_67], %190 {strides = array<i32>} : memref<1x8x7x128xf32, #tpu.memory_space<vmem>>, vector<1x1x7x128xf32>,
    return
  }
  func.func @transform_0(%arg0: i32, %arg1: i32) -> (i32, i32) {
    %c0_i32 = arith.constant 0 : i32
    %c0_i32_0 = arith.constant 0 : i32
    %c0_i32_1 = arith.constant 0 : i32
    return %c0_i32, %c0_i32_0 : i32, i32
  }
  func.func @transform_1(%arg0: i32, %arg1: i32) -> (i32, i32, i32) {
    %c0_i32 = arith.constant 0 : i32
    %c0_i32_0 = arith.constant 0 : i32
    return %arg0, %arg1, %c0_i32 : i32, i32, i32
  }
  func.func @transform_2(%arg0: i32, %arg1: i32) -> (i32, i32, i32) {
    %c0_i32 = arith.constant 0 : i32
    %c0_i32_0 = arith.constant 0 : i32
    return %arg0, %c0_i32, %arg1 : i32, i32, i32
  }
  func.func @transform_3(%arg0: i32, %arg1: i32) -> (i32, i32, i32) {
    %c0_i32 = arith.constant 0 : i32
    %c0_i32_0 = arith.constant 0 : i32
    %c0_i32_1 = arith.constant 0 : i32
    return %arg0, %c0_i32, %c0_i32_0 : i32, i32, i32
  }
  func.func @transform_4(%arg0: i32, %arg1: i32) -> (i32, i32, i32, i32) {
    %c0_i32 = arith.constant 0 : i32
    %c0_i32_0 = arith.constant 0 : i32
    %c0_i32_1 = arith.constant 0 : i32
    return %arg0, %c0_i32, %c0_i32_0, %arg1 : i32, i32, i32, i32
  }
}

</mosaic_0001>

<bundles_post_ra>
// kernel: tpu_custom_call.1
= control target key start
LH: loop header
LB: loop body
LE: loop exit
PB: predicated region body
PF: predicated region fallthrough
CT: control target
= control target key end

     0   :  { %s3121_s0 = inlined_call_operand.hbm [shape: bf16[64,64], index: 0, kind: input, shape index: {}]   ;;  %s3122_s1 = inlined_call_operand.hbm [shape: f32[2,128,3], index: 1, kind: input, shape index: {}]   ;;  %s3123_s2 = inlined_call_operand.hbm [shape: f32[2,7,128], index: 2, kind: input, shape index: {}]   ;;  %s3124_s3 = inlined_call_operand.hbm [shape: f32[2,7,64], index: 3, kind: input, shape index: {}]   ;;  %s3125_s4 = inlined_call_operand.hbm [shape: f32[2,8,7,128], index: 4, kind: output, shape index: {}]  }
   0x1   :  { %3141 = sst [smem:[#allocation19_spill]] %s3122_s1 }
   0x2   :  { %9 = vsyncpa [#allocation3], 0 }
   0x3   :  { %10 = vsyncpa [#allocation6], 0 }
   0x4   :  { %12 = vsyncpa [#allocation6 + $0x1], 0 }
   0x5   :  { %13 = vsyncpa [#allocation9], 0 }
   0x6   :  { %15 = vsyncpa [#allocation9 + $0x1], 0 }
   0x7   :  { %16 = vsyncpa [#allocation4], 0 }
   0x8   :  { %18 = vsyncpa [#allocation4 + $0x1], 0  ;;  %s2248_s15 = smov 0   ;;  %s2250_s16 = smov 0  }
   0x9   :  { %s2252_s17 = smov 0   ;;  %s2254_s18 = smov 0  }
   0xa   :  { %s2256_s19 = smov 0   ;;  %s2258_s20 = smov 0  }
   0xb LB: > { %3142 = sst [smem:[#allocation15_spill]] %s2194_s17  ;;  %s36_s21 = sadd.s32 1, %s2202_s19  ;;  %s2206_s20 = sphi %s2258_s20, %s24_s20   ;;  %s2202_s19 = sphi %s2256_s19, %s3174_s19   ;;  %s2198_s18 = sphi %s2254_s18, %s3173_s18   ;;  %s2194_s17 = sphi %s2252_s17, %s3169_s17   ;;  %s2190_s16 = sphi %s2250_s16, %s3172_s16   ;;  %s2186_s15 = sphi %s2248_s15, %s3171_s15  }
   0xc   : > { %3143 = sst [smem:[#allocation16_spill]] %s2206_s20  ;;  %s66_s22 = sadd.s32 1, %s2194_s17 }
   0xd   : > { %p38_p0 = scmp.ge.s32.totalorder %s36_s21, 2  ;;  %p3126_p1 = scmp.ne.s32.totalorder %s2194_s17, %s2190_s16 }
   0xe   : > { %p74_p2 = scmp.eq.s32.totalorder %s2206_s20, 0  ;;  %p1899_p5 = scmp.lt.s32.totalorder %s2206_s20, 2 }
   0xf   : > { %s3176_s21 = smov (%p38_p0, %s36_s21), 0  ;;  %s198_s24 = sand.u32 1, %s2206_s20  }
  0x10   : > { %3144 = sst [smem:[#allocation17_spill]] %s3176_s21  ;;  %p75_p4 = por %p74_p2, %p3126_p1 }
  0x11   : > { %s61_s23 = ssub.s32 %s2202_s19, %s3176_s21  ;;  %s2294_s25 = sand.u32 1, %s2194_s17  }
  0x12   : > { %p64_p6 = scmp.eq.s32.totalorder %s61_s23, 0  ;;  %s1778_s26 = sshll.u32 %s2202_s19, 11 }
  0x13   : > { %s1715_s28 = sshll.u32 %s2294_s25, 7  ;;  %s3146_s1 = sld [smem:[#allocation19_spill]] }
  0x14   : > { %s2298_s27 = scalar_select %p64_p6, %s2194_s17, %s66_s22  }
  0x15   : > { %p2306_p7 = pnand %p1899_p5, %p75_p4  ;;  %s202_s7 = scalar_lea.vmem [#allocation5], %s1715_s28 }
  0x16   : > { %3145 = sst [smem:[#allocation18_spill]] %s2298_s27  ;;  %s211_s8 = sshll.u32 %s202_s7, 4  ;;  %s2310_s8 = int_to_ptr.vmem [resolvable:$true] %s211_s8 }
  0x17   : > { %s3147_s6 = scalar_select %p2306_p7, 1, 0 }
  0x18   : > { %s2312_s9 = scalar_lea.sflag [#allocation6], %s198_s24  ;;  %p2318_p9 = pneg %p2306_p7 }
  0x19   : > { %s2304_s5 = scalar_lea.hbm %s3146_s1, %s1778_s26  ;;  %s2003_s14 = scalar_lea.hbm %s3146_s1, 4096 }
  0x1a   : > { %s1998_s10 = scalar_lea.hbm %s2304_s5, 2048  ;;  %p2004_p12 = scmp.lt.u32.totalorder %s2304_s5, %s3146_s1 }
  0x1b   : > { %p1999_p8 = scmp.ne.s32.totalorder %s2304_s5, %s1998_s10  ;;  %p2005_p13 = scmp.lt.u32.totalorder %s2003_s14, %s1998_s10 }
  0x1c   : > { %s3148_s11 = scalar_select %p2318_p9, 1, 0 }
  0x1d   : > { %p2001_p10 = pnand %p2318_p9, %p1999_p8  ;;  %p2006_p0 = por %p2005_p13, %p2004_p12 }
  0x1e   : > { %p2007_p2 = scmp.lt.u32.totalorder %s1998_s10, %s2304_s5 }
  0x1f   : > { %p2002_p11 = pneg %p2001_p10 }
  0x20   : > { %p2008_p4 = por %p2007_p2, %p2006_p0 }
  0x22   : > { %p2009_p5 = pnand %p2008_p4, %p2002_p11 }
  0x24   : > { %2012 = shalt.err (!%p2009_p5)
}
  0x25   : > { %s2013_s24 = scalar_lea.vmem %s2310_s8, 2048  ;;  %s2208_s26 = smov [#allocation5]  }
  0x26   : > { %p2014_p6 = scmp.ne.s32.totalorder %s2310_s8, %s2013_s24  ;;  %s2018_s28 = sshll.u32 %s2208_s26, 4  ;;  %s2019_s28 = int_to_ptr.vmem [resolvable:$false] %s2018_s28 }
  0x27   : > { %s2020_s29 = scalar_lea.vmem %s2019_s28, 4096  ;;  %p2021_p3 = scmp.lt.s32.totalorder %s2310_s8, %s2019_s28 }
  0x28   : > { %p2016_p8 = pnand %p2014_p6, %p2318_p9  ;;  %p2022_p1 = scmp.lt.s32.totalorder %s2020_s29, %s2013_s24 }
  0x2a   : > { %p2017_p10 = pneg %p2016_p8  ;;  %p2023_p12 = por %p2022_p1, %p2021_p3 }
  0x2c   : > { %p2024_p13 = pnand %p2023_p12, %p2017_p10 }
  0x2e   : > { %2027 = shalt.err (!%p2024_p13)
}
  0x2f   : > { %s2209_s30 = smov 128   ;;  %s2210_s7 = smov 8  }
  0x30   : > { %1887 = dma.hbm_to_vmem [thread:$0]  (!%p2306_p7), %s2304_s5, 2048, %s2310_s8, %s2312_s9, %s2209_s30, %s2209_s30, %s2210_s7  }
  0x31   : > { %s2343_s10 = sadd.s32 4294967295, %s2206_s20   ;;  %s1711_s12 = sadd.s32 4294967294, %s2206_s20  }
  0x32   : > { %p79_p1 = scmp.ne.s32.totalorder %s2190_s16, %s2186_s15  ;;  %p3131_p3 = scmp.eq.s32.totalorder %s2343_s10, 0 }
  0x33   : > { %p159_p11 = scmp.eq.s32.totalorder %s2343_s10, 1  ;;  %p165_p0 = scmp.eq.s32.totalorder %s1711_s12, 1 }
  0x34   : > { %p1712_p2 = scmp.ge.s32.totalorder %s2206_s20, 1  ;;  %p2353_p4 = por %p3131_p3, %p79_p1 }
  0x35   : > { %p3150_p5 = scmp.ne.s32.totalorder %s2194_s17, %s2190_s16  ;;  %p2364_p8 = por %p165_p0, %p79_p1 }
  0x36   : > { %s3149_s13 = scalar_select %p2353_p4, 1, 0 }
  0x37   : > { %p2360_p6 = por %p159_p11, %p3150_p5  ;;  %p172_p10 = scmp.lt.s32.totalorder %s2206_s20, 3 }
  0x38   : > { %s3152_s8 = scalar_select %p2364_p8, 1, 0 }
  0x39   : > { %s3151_s5 = scalar_select %p2360_p6, 1, 0 }
  0x3a   : > { %p2369_p12 = pnand %p1712_p2, %p172_p10  ;;  %s2211_s22 = smov [#allocation2]  }
  0x3b   : > { %s184_s23 = sshll.u32 %s2211_s22, 4  ;;  %s3139_s24 = sshll.u32 %s2294_s25, 3  ;;  %s2373_s23 = int_to_ptr.vmem [resolvable:$true] %s184_s23 }
  0x3c   : > { %s3153_s14 = scalar_select %p2369_p12, 1, 0 }
  0x3d   : > { %p1880_p13 = pneg %p2369_p12  ;;  %s3140_s26 = sshll.u32 %s2202_s19, 7 }
  0x3e   : > { %s2390_s7 = scalar_lea.hbm %s3123_s2, %s3140_s26  ;;  %s225_s12 = scalar_lea.vmem [#allocation7], %s3139_s24 }
  0x3f   : > { %p2381_p11 = pnand %p1880_p13, %p3131_p3  ;;  %s233_s22 = sshll.u32 %s225_s12, 4  ;;  %s2394_s22 = int_to_ptr.vmem [resolvable:$true] %s233_s22 }
  0x40   : > { %s2028_s27 = scalar_lea.hbm %s3121_s0, 512 }
  0x41   : > { %p2029_p1 = scmp.ne.s32.totalorder %s3121_s0, %s2028_s27  ;;  %p2030_p0 = pneg %p2381_p11 }
  0x42   : > { %p2035_p10 = scmp.lt.u32.totalorder %s2028_s27, %s3121_s0 }
  0x43   : > { %p2031_p2 = pnand %p2030_p0, %p2029_p1 }
  0x45   : > { %p2032_p5 = pneg %p2031_p2 }
  0x47   : > { %p2037_p13 = pnand %p2035_p10, %p2032_p5 }
  0x49   : > { %2040 = shalt.err (!%p2037_p13)
}
  0x4a   : > { %s2041_s12 = scalar_lea.vmem %s2373_s23, 512  ;;  %p2049_p4 = scmp.lt.s32.totalorder %s2373_s23, %s2373_s23 }
  0x4b   : > { %p2042_p3 = scmp.ne.s32.totalorder %s2373_s23, %s2041_s12  ;;  %p2050_p12 = scmp.lt.s32.totalorder %s2041_s12, %s2041_s12 }
  0x4d   : > { %p2044_p8 = pnand %p2042_p3, %p2030_p0  ;;  %p2051_p7 = por %p2050_p12, %p2049_p4 }
  0x4f   : > { %p2045_p6 = pneg %p2044_p8 }
  0x51   : > { %p2052_p9 = pnand %p2051_p7, %p2045_p6 }
  0x53   : > { %2055 = shalt.err (!%p2052_p9)
}
  0x54   : > { %s2212_s1 = smov 64   ;;  %s2213_s17 = smov 4  }
  0x55   : > { %1883 = dma.hbm_to_vmem [thread:$0]  (!%p2381_p11), %s3121_s0, 512, %s2373_s23, [#allocation3], %s2212_s1, %s2212_s1, %s2213_s17  }
  0x56   : > { %s2056_s27 = scalar_lea.hbm %s2390_s7, 128  ;;  %p3155_p8 = scmp.ne.s32.totalorder %s3148_s11, 0 }
  0x57   : > { %p2057_p3 = scmp.ne.s32.totalorder %s2390_s7, %s2056_s27  ;;  %s2061_s12 = scalar_lea.hbm %s3123_s2, 256 }
  0x58   : > { %p2062_p9 = scmp.lt.u32.totalorder %s2390_s7, %s3123_s2  ;;  %p2063_p6 = scmp.lt.u32.totalorder %s2061_s12, %s2056_s27 }
  0x59   : > { %p2059_p4 = pnand %p2057_p3, %p3155_p8  ;;  %p2065_p1 = scmp.lt.u32.totalorder %s2056_s27, %s2390_s7 }
  0x5a   : > { %p2064_p12 = por %p2063_p6, %p2062_p9 }
  0x5b   : > { %p2060_p7 = pneg %p2059_p4 }
  0x5c   : > { %p2066_p0 = por %p2065_p1, %p2064_p12 }
  0x5e   : > { %p2067_p2 = pnand %p2066_p0, %p2060_p7 }
  0x60   : > { %2070 = shalt.err (!%p2067_p2)
}
  0x61   : > { %s2071_s23 = scalar_lea.vmem %s2394_s22, 128  ;;  %s2214_s28 = smov [#allocation7]  }
  0x62   : > { %p2072_p11 = scmp.ne.s32.totalorder %s2394_s22, %s2071_s23  ;;  %s2076_s1 = sshll.u32 %s2214_s28, 4  ;;  %s2077_s1 = int_to_ptr.vmem [resolvable:$false] %s2076_s1 }
  0x63   : > { %s2078_s24 = scalar_lea.vmem %s2077_s1, 256  ;;  %p2079_p13 = scmp.lt.s32.totalorder %s2394_s22, %s2077_s1 }
  0x64   : > { %p2074_p5 = pnand %p2072_p11, %p3155_p8  ;;  %p2080_p3 = scmp.lt.s32.totalorder %s2078_s24, %s2071_s23 }
  0x66   : > { %p2075_p10 = pneg %p2074_p5  ;;  %p2081_p4 = por %p2080_p3, %p2079_p13 }
  0x68   : > { %p2082_p9 = pnand %p2081_p4, %p2075_p10 }
  0x6a   : > { %2085 = shalt.err (!%p2082_p9)
}
  0x6b   : > { %p3156_p7 = scmp.ne.s32.totalorder %s3147_s6, 0  ;;  %s3157_s26 = sshll.u32 %s2202_s19, 7 }
  0x6c   : > { %s2444_s21 = scalar_lea.hbm %s3124_s3, %s3157_s26  ;;  %s3158_s27 = sshll.u32 %s2294_s25, 3 }
  0x6d   : > { %1890 = dma.hbm_to_vmem [thread:$0]  (!%p3156_p7), %s2390_s7, 128, %s2394_s22, %s2312_s9  }
  0x6e   : > { %s244_s29 = scalar_lea.vmem [#allocation8], %s3158_s27  ;;  %s241_s12 = scalar_lea.sflag [#allocation9], %s2294_s25 }
  0x6f   : > { %s251_s30 = sshll.u32 %s244_s29, 4  ;;  %s2086_s23 = scalar_lea.hbm %s2444_s21, 128  ;;  %s252_s30 = int_to_ptr.vmem [resolvable:$true] %s251_s30 }
  0x70   : > { %p2087_p6 = scmp.ne.s32.totalorder %s2444_s21, %s2086_s23  ;;  %s2091_s22 = scalar_lea.hbm %s3124_s3, 256 }
  0x71   : > { %p2092_p0 = scmp.lt.u32.totalorder %s2444_s21, %s3124_s3  ;;  %p2093_p2 = scmp.lt.u32.totalorder %s2091_s22, %s2086_s23 }
  0x72   : > { %p2089_p12 = pnand %p2087_p6, %p3155_p8  ;;  %p2095_p5 = scmp.lt.u32.totalorder %s2086_s23, %s2444_s21 }
  0x73   : > { %p2094_p11 = por %p2093_p2, %p2092_p0 }
  0x74   : > { %p2090_p1 = pneg %p2089_p12 }
  0x75   : > { %p2096_p10 = por %p2095_p5, %p2094_p11 }
  0x77   : > { %p2097_p13 = pnand %p2096_p10, %p2090_p1 }
  0x79   : > { %2100 = shalt.err (!%p2097_p13)
}
  0x7a   : > { %s2101_s25 = scalar_lea.vmem %s252_s30, 128  ;;  %s2215_s24 = smov [#allocation8]  }
  0x7b   : > { %p2102_p3 = scmp.ne.s32.totalorder %s252_s30, %s2101_s25  ;;  %s2106_s26 = sshll.u32 %s2215_s24, 4  ;;  %s2107_s26 = int_to_ptr.vmem [resolvable:$false] %s2106_s26 }
  0x7c   : > { %s2108_s17 = scalar_lea.vmem %s2107_s26, 256  ;;  %p2109_p6 = scmp.lt.s32.totalorder %s252_s30, %s2107_s26 }
  0x7d   : > { %p2104_p4 = pnand %p2102_p3, %p3155_p8  ;;  %p2110_p12 = scmp.lt.s32.totalorder %s2108_s17, %s2101_s25 }
  0x7f   : > { %p2105_p9 = pneg %p2104_p4  ;;  %p2111_p7 = por %p2110_p12, %p2109_p6 }
  0x81   : > { %p2112_p0 = pnand %p2111_p7, %p2105_p9 }
  0x83   : > { %2115 = shalt.err (!%p2112_p0)
}
  0x84   : > { %p3159_p2 = scmp.ne.s32.totalorder %s3147_s6, 0  ;;  %p3160_p1 = scmp.ne.s32.totalorder %s3153_s14, 0 }
  0x85   : > { %p3161_p11 = scmp.eq.s32.totalorder (!%p3160_p1), %s2343_s10, 0 }
  0x86   : > { %1893 = dma.hbm_to_vmem [thread:$0]  (!%p3159_p2), %s2444_s21, 128, %s252_s30, %s241_s12  }
  0x87   : > { %260 = sbr.rel (%p3160_p1) target bundleno = 1054 (0x41e), region = 36 }
  0x8e   : > { %2169 = dma.done.wait (%p3161_p11), [#allocation3], 512   ;;  %p3162_p8 = pmov %p3161_p11 }
  0x8f   : > { %s266_s11 = sand.u32 1, %s2343_s10   ;;  %s2474_s20 = sand.u32 1, %s2190_s16  }
  0x90   : > { %2171 = vsyncadd (%p3162_p8), [#allocation3], 4294966784  ;;  %s1724_s27 = sshll.u32 %s2474_s20, 7  ;;  %s267_s6 = scalar_lea.sflag [#allocation6], %s266_s11 }
  0x91   : > { %s2477_s29 = scalar_lea.vmem [#allocation5], %s1724_s27  ;;  %p3163_p7 = scmp.ne.s32.totalorder %s3149_s13, 0 }
  0x93   : > { %2173 = dma.done.wait (%p3163_p7), %s267_s6, 2176  }
  0x94   : > { %2175 = vsyncadd (%p3163_p7), %s267_s6, 4294965120  ;;  %s1725_s14 = sshll.u32 %s2474_s20, 3  ;;  %s285_s30 = scalar_lea.sflag [#allocation9], %s2474_s20 }
  0x95   : > { %s2484_s21 = scalar_lea.vmem [#allocation7], %s1725_s14  ;;  %s2487_s10 = scalar_lea.vmem [#allocation8], %s1725_s14 }
  0x96   : > { %2177 = dma.done.wait (%p3163_p7), %s285_s30, 128  }
  0x97   : > { %2179 = vsyncadd (%p3163_p7), %s285_s30, 4294967168  ;;  %v2216_v0 = vmov 0   ;;  %v327_v1 = vld [vmem:[%s2477_s29 + $0x8] sm:$0xff]  ;;  %v326_v2 = vld [vmem:[%s2477_s29] sm:$0xff]  ;;  %v2217_v4 = vmov 1   ;;  %v2218_v6 = vmov 2   ;;  %v423_v37 = vlaneseq }
  0x98   : > { %1962 = vset.pattern.permute.xlu1 %v2216_v0  ;;  %1961 = vset.pattern.permute.xlu0 %v2216_v0  ;;  %v328_v3 = vld [vmem:[%s2477_s29 + $0x10] sm:$0xff]  ;;  %v329_v5 = vld [vmem:[%s2477_s29 + $0x18] sm:$0xff]  ;;  %v334_v8 = vld [vmem:[%s2477_s29 + $0x40] sm:$0xff]  ;;  %v2219_v12 = vmov 0.0   ;;  %vm819_vm13 = vcmask 523264   ;;  %s1727_s13 = sshll.u32 %s2474_s20, 6 }
  0x99   : > { %350 = vperm.xlu1 %1962, %v327_v1   ;;  %345 = vperm.xlu0 %1961, %v326_v2   ;;  %v333_v7 = vld [vmem:[%s2477_s29 + $0x38] sm:$0xff]  ;;  %v338_v9 = vld [vmem:[%s2477_s29 + $0x60] sm:$0xff]  ;;  %v339_v10 = vld [vmem:[%s2477_s29 + $0x68] sm:$0xff]  ;;  %v2551_v39 = vshrl.u32 %v423_v37, 7  ;;  %s322_s12 = scalar_lea.vmem [#allocation10], %s1727_s13  ;;  %s1779_s9 = sshll.u32 %s2198_s18, 10 }
  0x9a   : > { %v330_v11 = vld [vmem:[%s2477_s29 + $0x20] sm:$0xff]  ;;  %1170 = vmatprep.mubr.f32.mxu1 %v2219_v12  ;;  %v331_v13 = vld [vmem:[%s2477_s29 + $0x28] sm:$0xff]  ;;  %v332_v14 = vld [vmem:[%s2477_s29 + $0x30] sm:$0xff]  ;;  %s1568_s23 = sshll.u32 %s322_s12, 4  ;;  %s3072_s28 = scalar_lea.hbm %s3125_s4, %s1779_s9  ;;  %s3067_s23 = int_to_ptr.vmem [resolvable:$true] %s1568_s23 }
  0x9b   : > { %v336_v15 = vld [vmem:[%s2477_s29 + $0x50] sm:$0xff]  ;;  %v337_v16 = vld [vmem:[%s2477_s29 + $0x58] sm:$0xff]  ;;  %v335_v18 = vld [vmem:[%s2477_s29 + $0x48] sm:$0xff]  ;;  %v541_v42 = vsub.s32 1, %v2551_v39  ;;  %v425_v43 = vsub.s32 0, %v2551_v39  ;;  %v657_v48 = vsub.s32 2, %v2551_v39 }
  0x9c   : > { %v341_v17 = vld [vmem:[%s2477_s29 + $0x78] sm:$0xff]  ;;  %v340_v19 = vld [vmem:[%s2477_s29 + $0x70] sm:$0xff]  ;;  %s1554_s18 = scalar_lea.sflag [#allocation4], %s2474_s20  ;;  %s2116_s1 = scalar_lea.vmem %s3067_s23, 1024 }
  0x9d   : > { %1963 = vset.pattern.permute.xlu1 %v2217_v4  ;;  %355 = vperm.xlu0 %1961, %v328_v3   ;;  %v2558_v44 = vld [vmem:[%s2487_s10] sm:$0x7f]  ;;  %p2117_p5 = scmp.ne.s32.totalorder %s3067_s23, %s2116_s1  ;;  %p3164_p10 = scmp.ne.s32.totalorder %s3151_s5, 0 }
  0x9e   : > { %480 = vperm.xlu1 %1963, %v327_v1   ;;  %v2563_v47 = vrot.slane %v2558_v44, %v541_v42  ;;  %v2567_v49 = vrot.slane %v2558_v44, %v425_v43  ;;  %v2573_v53 = vrot.slane %v2558_v44, %v657_v48  ;;  %s2220_s25 = smov [#allocation10]  }
  0x9f   : > { %p2118_p13 = pnand %p2117_p5, %p3164_p10  ;;  %s2120_s24 = sshll.u32 %s2220_s25, 4  ;;  %s2121_s24 = int_to_ptr.vmem [resolvable:$false] %s2120_s24 }
  0xa0   : > { %s2122_s26 = scalar_lea.vmem %s2121_s24, 2048  ;;  %p2123_p4 = scmp.lt.s32.totalorder %s3067_s23, %s2121_s24 }
  0xa1   : > { %360 = vperm.xlu0 %1961, %v329_v5   ;;  %p2119_p3 = pneg %p2118_p13  ;;  %p2124_p9 = scmp.lt.s32.totalorder %s2122_s26, %s2116_s1 }
  0xa2   : > { %1964 = vset.pattern.permute.xlu1 %v2218_v6 }
  0xa3   : > { %592 = vperm.xlu1 %1964, %v326_v2   ;;  %p2125_p6 = por %p2124_p9, %p2123_p4 }
  0xa5   : > { %380 = vperm.xlu0 %1961, %v333_v7   ;;  %p2126_p12 = pnand %p2125_p6, %p2119_p3 }
  0xa7   : > { %1965 = vset.pattern.permute.xlu1 %v2217_v4 }
  0xa8   : > { %484 = vperm.xlu1 %1965, %v328_v3  }
  0xa9   : > { %385 = vperm.xlu0 %1961, %v334_v8  }
  0xac   : > { %1966 = vset.pattern.permute.xlu1 %v2218_v6 }
  0xad   : > { %596 = vperm.xlu1 %1966, %v327_v1   ;;  %405 = vperm.xlu0 %1961, %v338_v9  }
  0xb1   : > { %1967 = vset.pattern.permute.xlu1 %v2217_v4  ;;  %410 = vperm.xlu0 %1961, %v339_v10  }
  0xb2   : > { %488 = vperm.xlu1 %1967, %v329_v5  }
  0xb5   : > { %1985 = vset.pattern.permute.xlu0 %v2218_v6 }
  0xb6   : > { %1968 = vset.pattern.permute.xlu1 %v2216_v0  ;;  %600 = vperm.xlu0 %1985, %v328_v3  }
  0xb7   : > { %365 = vperm.xlu1 %1968, %v330_v11  }
  0xba   : > { %604 = vperm.xlu0 %1985, %v329_v5  }
  0xbb   : > { %1969 = vset.pattern.permute.xlu1 %v2217_v4 }
  0xbc   : > { %492 = vperm.xlu1 %1969, %v330_v11  }
  0xbe   : > { %620 = vperm.xlu0 %1985, %v333_v7  }
  0xc0   : > { %1970 = vset.pattern.permute.xlu1 %v2216_v0 }
  0xc1   : > { %370 = vperm.xlu1 %1970, %v331_v13  }
  0xc2   : > { %624 = vperm.xlu0 %1985, %v334_v8  }
  0xc5   : > { %1971 = vset.pattern.permute.xlu1 %v2218_v6 }
  0xc6   : > { %608 = vperm.xlu1 %1971, %v330_v11   ;;  %640 = vperm.xlu0 %1985, %v338_v9  }
  0xca   : > { %1972 = vset.pattern.permute.xlu1 %v2216_v0  ;;  %644 = vperm.xlu0 %1985, %v339_v10  }
  0xcb   : > { %375 = vperm.xlu1 %1972, %v332_v14  }
  0xce   : > { %1989 = vset.pattern.permute.xlu0 %v2217_v4 }
  0xcf   : > { %1973 = vset.pattern.permute.xlu1 %v2218_v6  ;;  %476 = vperm.xlu0 %1989, %v326_v2  }
  0xd0   : > { %612 = vperm.xlu1 %1973, %v331_v13  }
  0xd3   : > { %496 = vperm.xlu0 %1989, %v331_v13  }
  0xd4   : > { %1974 = vset.pattern.permute.xlu1 %v2217_v4 }
  0xd5   : > { %504 = vperm.xlu1 %1974, %v333_v7  }
  0xd7   : > { %500 = vperm.xlu0 %1989, %v332_v14  }
  0xd9   : > { %1975 = vset.pattern.permute.xlu1 %v2218_v6 }
  0xda   : > { %616 = vperm.xlu1 %1975, %v332_v14  }
  0xdb   : > { %516 = vperm.xlu0 %1989, %v336_v15  }
  0xde   : > { %1976 = vset.pattern.permute.xlu1 %v2217_v4 }
  0xdf   : > { %508 = vperm.xlu1 %1976, %v334_v8   ;;  %520 = vperm.xlu0 %1989, %v337_v16  }
  0xe3   : > { %1977 = vset.pattern.permute.xlu1 %v2216_v0  ;;  %536 = vperm.xlu0 %1989, %v341_v17  }
  0xe4   : > { %390 = vperm.xlu1 %1977, %v335_v18  }
  0xe8   : > { %1978 = vset.pattern.permute.xlu1 %v2217_v4 }
  0xe9   : > { %512 = vperm.xlu1 %1978, %v335_v18  }
  0xed   : > { %1979 = vset.pattern.permute.xlu1 %v2216_v0 }
  0xee   : > { %395 = vperm.xlu1 %1979, %v336_v15  }
  0xf2   : > { %1980 = vset.pattern.permute.xlu1 %v2218_v6 }
  0xf3   : > { %628 = vperm.xlu1 %1980, %v335_v18  }
  0xf7   : > { %1981 = vset.pattern.permute.xlu1 %v2216_v0 }
  0xf8   : > { %400 = vperm.xlu1 %1981, %v337_v16  }
  0xfc   : > { %1982 = vset.pattern.permute.xlu1 %v2218_v6 }
  0xfd   : > { %632 = vperm.xlu1 %1982, %v336_v15  }
 0x101   : > { %1983 = vset.pattern.permute.xlu1 %v2217_v4 }
 0x102   : > { %524 = vperm.xlu1 %1983, %v338_v9  }
 0x106   : > { %1984 = vset.pattern.permute.xlu1 %v2218_v6 }
 0x107   : > { %636 = vperm.xlu1 %1984, %v337_v16  }
 0x10b   : > { %1986 = vset.pattern.permute.xlu1 %v2217_v4 }
 0x10c   : > { %528 = vperm.xlu1 %1986, %v339_v10  }
 0x110   : > { %1987 = vset.pattern.permute.xlu1 %v2216_v0 }
 0x111   : > { %415 = vperm.xlu1 %1987, %v340_v19  }
 0x115   : > { %1988 = vset.pattern.permute.xlu1 %v2217_v4 }
 0x116   : > { %532 = vperm.xlu1 %1988, %v340_v19  }
 0x118   : > { %v351_v20 = vpop.permute.xlu1 %350  ;;  %v346_v21 = vpop.permute.xlu0 %345 }
 0x119   : > { %v428_v54 = vsub.f32 %v351_v20, %v2567_v49  ;;  %v427_v55 = vsub.f32 %v346_v21, %v2567_v49 }
 0x11a   : > { %1990 = vset.pattern.permute.xlu1 %v2216_v0 }
 0x11b   : > { %420 = vperm.xlu1 %1990, %v341_v17   ;;  %v444_v0 = vmul.f32 %v428_v54, %v428_v54  ;;  %v443_v1 = vmul.f32 %v427_v55, %v427_v55 }
 0x11c   : > { %v356_v22 = vpop.permute.xlu0 %355 }
 0x11d   : > { %v481_v23 = vpop.permute.xlu1 %480  ;;  %v429_v57 = vsub.f32 %v356_v22, %v2567_v49 }
 0x11e   : > { %v544_v51 = vsub.f32 %v481_v23, %v2563_v47 }
 0x11f   : > { %1991 = vset.pattern.permute.xlu1 %v2218_v6  ;;  %v445_v5 = vmul.f32 %v429_v57, %v429_v57 }
 0x120   : > { %648 = vperm.xlu1 %1991, %v340_v19   ;;  %v361_v24 = vpop.permute.xlu0 %360  ;;  %v560_v58 = vmul.f32 %v544_v51, %v544_v51 }
 0x121   : > { %v430_v13 = vsub.f32 %v361_v24, %v2567_v49 }
 0x122   : > { %v593_v25 = vpop.permute.xlu1 %592  ;;  %v576_v7 = vadd.f32 %v560_v58, %v444_v0 }
 0x123   : > { %v659_v60 = vsub.f32 %v593_v25, %v2573_v53  ;;  %v446_v23 = vmul.f32 %v430_v13, %v430_v13 }
 0x124   : > { %652 = vperm.xlu1 %1991, %v341_v17   ;;  %v2541_v26 = vpop.permute.xlu0 %380 }
 0x125   : > { %v675_v8 = vmul.f32 %v659_v60, %v659_v60 }
 0x127   : > { %v485_v27 = vpop.permute.xlu1 %484 }
 0x128   : > { %v2543_v28 = vpop.permute.xlu0 %385  ;;  %v545_v61 = vsub.f32 %v485_v27, %v2563_v47 }
 0x12a   : > { %v561_v9 = vmul.f32 %v545_v61, %v545_v61 }
 0x12c   : > { %v597_v29 = vpop.permute.xlu1 %596  ;;  %v2545_v30 = vpop.permute.xlu0 %405  ;;  %v577_v21 = vadd.f32 %v561_v9, %v445_v5 }
 0x12d   : > { %v660_v56 = vsub.f32 %v597_v29, %v2573_v53 }
 0x12f   : > { %v676_v2 = vmul.f32 %v660_v56, %v660_v56 }
 0x130   : > { %v2547_v31 = vpop.permute.xlu0 %410 }
 0x131   : > { %v489_v32 = vpop.permute.xlu1 %488  ;;  %v692_v16 = vadd.f32 %v676_v2, %v576_v7 }
 0x132   : > { %v546_v10 = vsub.f32 %v489_v32, %v2563_v47 }
 0x133   : > { %vm708_vm1 = vcmp.lt.f32.partialorder %v692_v16, 2.25 }
 0x134   : > { %v562_v22 = vmul.f32 %v546_v10, %v546_v10 }
 0x135   : > { %v601_v33 = vpop.permute.xlu0 %600 }
 0x136   : > { %v366_v34 = vpop.permute.xlu1 %365  ;;  %v661_v3 = vsub.f32 %v601_v33, %v2573_v53 }
 0x137   : > { %v431_v25 = vsub.f32 %v366_v34, %v2567_v49  ;;  %v1729_v34 = vsel %vm708_vm1, 1.0, %v2219_v12 }
 0x138   : > { %v677_v17 = vmul.f32 %v661_v3, %v661_v3  ;;  %v434_v3 = vsub.f32 %v2541_v26, %v2567_v49 }
 0x139   : > { %v605_v35 = vpop.permute.xlu0 %604  ;;  %v447_v48 = vmul.f32 %v431_v25, %v431_v25 }
 0x13a   : > { %v662_v18 = vsub.f32 %v605_v35, %v2573_v53  ;;  %v693_v24 = vadd.f32 %v677_v17, %v577_v21  ;;  %v450_v13 = vmul.f32 %v434_v3, %v434_v3 }
 0x13b   : > { %v493_v36 = vpop.permute.xlu1 %492 }
 0x13c   : > { %v547_v20 = vsub.f32 %v493_v36, %v2563_v47  ;;  %v678_v32 = vmul.f32 %v662_v18, %v662_v18  ;;  %v578_v36 = vadd.f32 %v562_v22, %v446_v23  ;;  %vm709_vm2 = vcmp.lt.f32.partialorder %v693_v24, 2.25 }
 0x13d   : > { %v2549_v38 = vpop.permute.xlu0 %620 }
 0x13e   : > { %v563_v35 = vmul.f32 %v547_v20, %v547_v20  ;;  %v666_v26 = vsub.f32 %v2549_v38, %v2573_v53 }
 0x140   : > { %v371_v40 = vpop.permute.xlu1 %370  ;;  %v579_v56 = vadd.f32 %v563_v35, %v447_v48  ;;  %v682_v21 = vmul.f32 %v666_v26, %v666_v26 }
 0x141   : > { %v2553_v41 = vpop.permute.xlu0 %624  ;;  %v432_v43 = vsub.f32 %v371_v40, %v2567_v49 }
 0x142   : > { %v667_v22 = vsub.f32 %v2553_v41, %v2573_v53 }
 0x143   : > { %v448_v58 = vmul.f32 %v432_v43, %v432_v43 }
 0x145   : > { %v609_v45 = vpop.permute.xlu1 %608  ;;  %v2560_v46 = vpop.permute.xlu0 %640 }
 0x146   : > { %v663_v27 = vsub.f32 %v609_v45, %v2573_v53  ;;  %v694_v45 = vadd.f32 %v678_v32, %v578_v36 }
 0x148   : > { %v679_v51 = vmul.f32 %v663_v27, %v663_v27  ;;  %vm710_vm3 = vcmp.lt.f32.partialorder %v694_v45, 2.25 }
 0x149   : > { %v2569_v50 = vpop.permute.xlu0 %644 }
 0x14a   : > { %v376_v52 = vpop.permute.xlu1 %375  ;;  %v695_v61 = vadd.f32 %v679_v51, %v579_v56 }
 0x14c   : > { %vm711_vm4 = vcmp.lt.f32.partialorder %v695_v61, 2.25 }
 0x14d   : > { %v1732_v16 = vsel %vm711_vm4, 1.0, %v2219_v12 }
 0x14e   : > { %v477_v59 = vpop.permute.xlu0 %476 }
 0x14f   : > { %v543_v62 = vsub.f32 %v477_v59, %v2563_v47  ;;  %v613_v63 = vpop.permute.xlu1 %612  ;;  %v433_v59 = vsub.f32 %v376_v52, %v2567_v49 }
 0x150   : > { %v664_v60 = vsub.f32 %v613_v63, %v2573_v53  ;;  %v1731_v63 = vsel %vm710_vm3, 1.0, %v2219_v12 }
 0x151   : > { %v559_v4 = vmul.f32 %v543_v62, %v543_v62  ;;  %v1730_v62 = vsel %vm709_vm2, 1.0, %v2219_v12  ;;  %vm936_vm2 = vcmp.eq.s32.totalorder %v2551_v39, 0 }
 0x152   : > { %v497_v14 = vpop.permute.xlu0 %496  ;;  %v680_v5 = vmul.f32 %v664_v60, %v664_v60 }
 0x153   : > { %v575_v11 = vadd.f32 %v559_v4, %v443_v1  ;;  %v548_v33 = vsub.f32 %v497_v14, %v2563_v47  ;;  %v449_v4 = vmul.f32 %v433_v59, %v433_v59  ;;  %v435_v14 = vsub.f32 %v2543_v28, %v2567_v49 }
 0x154   : > { %v505_v15 = vpop.permute.xlu1 %504 }
 0x155   : > { %v691_v19 = vadd.f32 %v675_v8, %v575_v11  ;;  %v564_v54 = vmul.f32 %v548_v33, %v548_v33  ;;  %v550_v40 = vsub.f32 %v505_v15, %v2563_v47  ;;  %v451_v20 = vmul.f32 %v435_v14, %v435_v14 }
 0x156   : > { %v501_v42 = vpop.permute.xlu0 %500 }
 0x157   : > { %vm707_vm0 = vcmp.lt.f32.partialorder %v691_v19, 2.25  ;;  %v549_v55 = vsub.f32 %v501_v42, %v2563_v47  ;;  %v580_v0 = vadd.f32 %v564_v54, %v448_v58  ;;  %v566_v52 = vmul.f32 %v550_v40, %v550_v40 }
 0x158   : > { %v1728_v29 = vsel %vm707_vm0, 1.0, %v2219_v12 }
 0x159   : > { %v617_v37 = vpop.permute.xlu1 %616  ;;  %755 = vxpose.xlu0.b32.start [1/16] (narrow) %v1728_v29, 64  ;;  %v565_v1 = vmul.f32 %v549_v55, %v549_v55  ;;  %v696_v11 = vadd.f32 %v680_v5, %v580_v0  ;;  %v582_v17 = vadd.f32 %v566_v52, %v450_v13  ;;  %v683_v29 = vmul.f32 %v667_v22, %v667_v22 }
 0x15a   : > { %v665_v2 = vsub.f32 %v617_v37, %v2573_v53  ;;  %v517_v54 = vpop.permute.xlu0 %516  ;;  %v439_v0 = vsub.f32 %v2545_v30, %v2567_v49 }
 0x15b   : > { %v581_v8 = vadd.f32 %v565_v1, %v449_v4  ;;  %vm712_vm5 = vcmp.lt.f32.partialorder %v696_v11, 2.25  ;;  %v698_v27 = vadd.f32 %v682_v21, %v582_v17  ;;  %v553_v56 = vsub.f32 %v517_v54, %v2563_v47 }
 0x15c   : > { %v681_v9 = vmul.f32 %v665_v2, %v665_v2  ;;  %v1733_v23 = vsel %vm712_vm5, 1.0, %v2219_v12  ;;  %v671_v4 = vsub.f32 %v2560_v46, %v2573_v53  ;;  %v440_v17 = vsub.f32 %v2547_v31, %v2567_v49 }
 0x15d   : > { %756 = vxpose.xlu0.b32.cont [2/16] (narrow) %v1729_v34, 64  ;;  %vm714_vm7 = vcmp.lt.f32.partialorder %v698_v27, 2.25  ;;  %v569_v60 = vmul.f32 %v553_v56, %v553_v56 }
 0x15e   : > { %v509_v57 = vpop.permute.xlu1 %508  ;;  %v697_v18 = vadd.f32 %v681_v9, %v581_v8  ;;  %v1735_v36 = vsel %vm714_vm7, 1.0, %v2219_v12  ;;  %v521_v5 = vpop.permute.xlu0 %520  ;;  %v687_v30 = vmul.f32 %v671_v4, %v671_v4  ;;  %v456_v22 = vmul.f32 %v440_v17, %v440_v17 }
 0x15f   : > { %v551_v10 = vsub.f32 %v509_v57, %v2563_v47  ;;  %v554_v52 = vsub.f32 %v521_v5, %v2563_v47 }
 0x160   : > { %vm713_vm6 = vcmp.lt.f32.partialorder %v697_v18, 2.25 }
 0x161   : > { %757 = vxpose.xlu0.b32.cont [3/16] (narrow) %v1730_v62, 64  ;;  %v567_v19 = vmul.f32 %v551_v10, %v551_v10  ;;  %v1734_v32 = vsel %vm713_vm6, 1.0, %v2219_v12  ;;  %v570_v14 = vmul.f32 %v554_v52, %v554_v52 }
 0x163   : > { %v391_v7 = vpop.permute.xlu1 %390  ;;  %v583_v28 = vadd.f32 %v567_v19, %v451_v20  ;;  %v672_v20 = vsub.f32 %v2569_v50, %v2573_v53 }
 0x164   : > { %v436_v24 = vsub.f32 %v391_v7, %v2567_v49 }
 0x165   : > { %758 = vxpose.xlu0.b32.cont [4/16] (narrow) %v1731_v63, 64  ;;  %v699_v37 = vadd.f32 %v683_v29, %v583_v28  ;;  %v455_v63 = vmul.f32 %v439_v0, %v439_v0  ;;  %v1993_v29 = vld [vmem:[#allocation2] sm:$0xff]  }
 0x166   : > { %v452_v41 = vmul.f32 %v436_v24, %v436_v24  ;;  %1796 = vmatprep.mubr.msk.bf16.mxu0 %vm819_vm13, %v1993_v29 }
 0x167   : > { %vm715_vm8 = vcmp.lt.f32.partialorder %v699_v37, 2.25 }
 0x168   : > { %v513_v15 = vpop.permute.xlu1 %512  ;;  %v1736_v55 = vsel %vm715_vm8, 1.0, %v2219_v12 }
 0x169   : > { %759 = vxpose.xlu0.b32.cont [5/16] (narrow) %v1732_v16, 64  ;;  %v552_v25 = vsub.f32 %v513_v15, %v2563_v47 }
 0x16b   : > { %v568_v33 = vmul.f32 %v552_v25, %v552_v25  ;;  %v688_v25 = vmul.f32 %v672_v20, %v672_v20 }
 0x16d   : > { %v396_v38 = vpop.permute.xlu1 %395  ;;  %760 = vxpose.xlu0.b32.cont [6/16] (narrow) %v1733_v23, 64  ;;  %v584_v43 = vadd.f32 %v568_v33, %v452_v41  ;;  %v537_v41 = vpop.permute.xlu0 %536 }
 0x16e   : > { %v437_v51 = vsub.f32 %v396_v38, %v2567_v49 }
 0x170   : > { %v453_v57 = vmul.f32 %v437_v51, %v437_v51 }
 0x171   : > { %761 = vxpose.xlu0.b32.cont [7/16] (narrow) %v1734_v32, 64 }
 0x172   : > { %v629_v35 = vpop.permute.xlu1 %628  ;;  %v585_v40 = vadd.f32 %v569_v60, %v453_v57 }
 0x173   : > { %v668_v42 = vsub.f32 %v629_v35, %v2573_v53 }
 0x175   : > { %v684_v48 = vmul.f32 %v668_v42, %v668_v42  ;;  %762 = vxpose.xlu0.b32.cont [8/16] (narrow) %v1735_v36, 64 }
 0x177   : > { %v700_v34 = vadd.f32 %v684_v48, %v584_v43  ;;  %v401_v45 = vpop.permute.xlu1 %400  ;;  %v558_v48 = vsub.f32 %v537_v41, %v2563_v47 }
 0x178   : > { %v438_v1 = vsub.f32 %v401_v45, %v2567_v49 }
 0x179   : > { %vm716_vm9 = vcmp.lt.f32.partialorder %v700_v34, 2.25  ;;  %763 = vxpose.xlu0.b32.cont [9/16] (narrow) %v1736_v55, 64  ;;  %v574_v57 = vmul.f32 %v558_v48, %v558_v48 }
 0x17a   : > { %v1737_v59 = vsel %vm716_vm9, 1.0, %v2219_v12  ;;  %v454_v10 = vmul.f32 %v438_v1, %v438_v1 }
 0x17c   : > { %v633_v58 = vpop.permute.xlu1 %632  ;;  %v586_v46 = vadd.f32 %v570_v14, %v454_v10  ;;  %v1996_v10 = vld [vmem:[#allocation2 + $0x18] sm:$0xff]  }
 0x17d   : > { %v669_v61 = vsub.f32 %v633_v58, %v2573_v53  ;;  %764 = vxpose.xlu0.b32.cont [10/16] (narrow) %v1737_v59, 64 }
 0x17f   : > { %v685_v62 = vmul.f32 %v669_v61, %v669_v61 }
 0x181   : > { %v701_v2 = vadd.f32 %v685_v62, %v585_v40  ;;  %v525_v3 = vpop.permute.xlu1 %524 }
 0x182   : > { %v555_v7 = vsub.f32 %v525_v3, %v2563_v47 }
 0x183   : > { %vm717_vm10 = vcmp.lt.f32.partialorder %v701_v2, 2.25 }
 0x184   : > { %v571_v8 = vmul.f32 %v555_v7, %v555_v7  ;;  %v1738_v9 = vsel %vm717_vm10, 1.0, %v2219_v12 }
 0x185   : > { %765 = vxpose.xlu0.b32.cont [11/16] (narrow) %v1738_v9, 64  ;;  %v1995_v9 = vld [vmem:[#allocation2 + $0x10] sm:$0xff]  }
 0x186   : > { %v587_v11 = vadd.f32 %v571_v8, %v455_v63  ;;  %v637_v13 = vpop.permute.xlu1 %636  ;;  %v1994_v8 = vld [vmem:[#allocation2 + $0x8] sm:$0xff]  }
 0x187   : > { %v670_v26 = vsub.f32 %v637_v13, %v2573_v53 }
 0x188   : > { %v703_v15 = vadd.f32 %v687_v30, %v587_v11 }
 0x189   : > { %v686_v16 = vmul.f32 %v670_v26, %v670_v26 }
 0x18a   : > { %vm719_vm12 = vcmp.lt.f32.partialorder %v703_v15, 2.25 }
 0x18b   : > { %v702_v18 = vadd.f32 %v686_v16, %v586_v46  ;;  %v529_v19 = vpop.permute.xlu1 %528  ;;  %v1740_v31 = vsel %vm719_vm12, 1.0, %v2219_v12 }
 0x18c   : > { %v556_v21 = vsub.f32 %v529_v19, %v2563_v47 }
 0x18d   : > { %vm718_vm11 = vcmp.lt.f32.partialorder %v702_v18, 2.25 }
 0x18e   : > { %v572_v23 = vmul.f32 %v556_v21, %v556_v21  ;;  %v1739_v28 = vsel %vm718_vm11, 1.0, %v2219_v12 }
 0x18f   : > { %766 = vxpose.xlu0.b32.cont [12/16] (narrow) %v1739_v28, 64 }
 0x190   : > { %v588_v38 = vadd.f32 %v572_v23, %v456_v22  ;;  %v416_v27 = vpop.permute.xlu1 %415  ;;  %v1752_v23 = vsel %vm936_vm2, 1.0, %v2219_v12 }
 0x191   : > { %v441_v35 = vsub.f32 %v416_v27, %v2567_v49 }
 0x192   : > { %v704_v24 = vadd.f32 %v688_v25, %v588_v38 }
 0x193   : > { %767 = vxpose.xlu0.b32.cont [13/16] (narrow) %v1740_v31, 64  ;;  %v457_v51 = vmul.f32 %v441_v35, %v441_v35 }
 0x194   : > { %vm720_vm14 = vcmp.lt.f32.partialorder %v704_v24, 2.25 }
 0x195   : > { %v533_v50 = vpop.permute.xlu1 %532  ;;  %v1741_v32 = vsel %vm720_vm14, 1.0, %v2219_v12 }
 0x196   : > { %v557_v33 = vsub.f32 %v533_v50, %v2563_v47 }
 0x197   : > { %768 = vxpose.xlu0.b32.cont [14/16] (narrow) %v1741_v32, 64 }
 0x198   : > { %v573_v42 = vmul.f32 %v557_v33, %v557_v33 }
 0x19a   : > { %v421_v37 = vpop.permute.xlu1 %420  ;;  %v589_v45 = vadd.f32 %v573_v42, %v457_v51 }
 0x19b   : > { %v442_v36 = vsub.f32 %v421_v37, %v2567_v49 }
 0x19d   : > { %v458_v54 = vmul.f32 %v442_v36, %v442_v36 }
 0x19f   : > { %v649_v43 = vpop.permute.xlu1 %648  ;;  %v590_v60 = vadd.f32 %v574_v57, %v458_v54 }
 0x1a0   : > { %v673_v34 = vsub.f32 %v649_v43, %v2573_v53 }
 0x1a2   : > { %v689_v55 = vmul.f32 %v673_v34, %v673_v34 }
 0x1a3   : > { %v653_v56 = vpop.permute.xlu1 %652 }
 0x1a4   : > { %v705_v58 = vadd.f32 %v689_v55, %v589_v45  ;;  %v674_v59 = vsub.f32 %v653_v56, %v2573_v53 }
 0x1a6   : > { %vm721_vm15 = vcmp.lt.f32.partialorder %v705_v58, 2.25  ;;  %v690_v61 = vmul.f32 %v674_v59, %v674_v59 }
 0x1a7   : > { %v1742_v40 = vsel %vm721_vm15, 1.0, %v2219_v12 }
 0x1a8   : > { %v706_v49 = vadd.f32 %v690_v61, %v590_v60  ;;  %769 = vxpose.xlu0.b32.cont [15/16] (narrow) %v1742_v40, 64 }
 0x1aa   : > { %vm722_vm0 = vcmp.lt.f32.partialorder %v706_v49, 2.25 }
 0x1ab   : > { %v1743_v47 = vsel %vm722_vm0, 1.0, %v2219_v12 }
 0x1ac   : > { %770 = vxpose.xlu0.b32.end [16/16] (narrow) %v1743_v47, 64 }
 0x1d5   : > { %1992 = vset.pattern.permute.xlu0 %v2218_v6 }
 0x1f0   : > { %v2648_v62 = vpop.trf.xlu0 }
 0x1f4   : > { %v2650_v0 = vpop.trf.xlu0 }
 0x1f5   : > { %v795_v53 = vpack.c.bf16 %v2650_v0, %v2648_v62  ;;  %v897_v30 = vadd.f32 %v2650_v0, %v2648_v62 }
 0x1f7   : > { %1788 = vmatprep.subr.bf16.mxu0 %v795_v53 }
 0x1f8   : > { %1789 = vmatpush3.bf16.msra.mxu0 %v795_v53  ;;  %v2654_v1 = vpop.trf.xlu0 }
 0x1f9   : > { %v898_v11 = vadd.f32 %v897_v30, %v2654_v1 }
 0x1fc   : > { %v2656_v2 = vpop.trf.xlu0 }
 0x1fd   : > { %v796_v3 = vpack.c.bf16 %v2656_v2, %v2654_v1  ;;  %v899_v13 = vadd.f32 %v898_v11, %v2656_v2 }
 0x1ff   : > { %1790 = vmatprep.subr.bf16.mxu0 %v796_v3 }
 0x200   : > { %1791 = vmatpush3.bf16.msra.mxu0 %v796_v3  ;;  %v2660_v4 = vpop.trf.xlu0 }
 0x201   : > { %v900_v14 = vadd.f32 %v899_v13, %v2660_v4 }
 0x204   : > { %v2662_v6 = vpop.trf.xlu0 }
 0x205   : > { %v797_v5 = vpack.c.bf16 %v2662_v6, %v2660_v4  ;;  %v901_v26 = vadd.f32 %v900_v14, %v2662_v6 }
 0x207   : > { %1792 = vmatprep.subr.bf16.mxu0 %v797_v5 }
 0x208   : > { %1793 = vmatpush3.bf16.msra.mxu0 %v797_v5  ;;  %v2666_v7 = vpop.trf.xlu0 }
 0x209   : > { %v902_v15 = vadd.f32 %v901_v26, %v2666_v7 }
 0x20c   : > { %v2668_v52 = vpop.trf.xlu0 }
 0x20d   : > { %v798_v63 = vpack.c.bf16 %v2668_v52, %v2666_v7  ;;  %v903_v46 = vadd.f32 %v902_v15, %v2668_v52 }
 0x20f   : > { %1794 = vmatprep.subr.bf16.mxu0 %v798_v63  ;;  %v904_v16 = vrot.slane %v903_v46, 4 }
 0x210   : > { %1795 = vmatpush3.bf16.msra.mxu0 %v798_v63 }
 0x211   : > { %v905_v17 = vadd.f32 %v904_v16, %v903_v46 }
 0x213   : > { %1797 = vmatmul.mubr.msk.bf16.vlgmr.msra.gmra.mrb[0].mxu0 %vm819_vm13, %v1994_v8  ;;  %v906_v18 = vrot.slane %v905_v17, 2 }
 0x214   : > { %1800 = vmatprep.mubr.msk.bf16.mxu0 %vm819_vm13, %v1995_v9 }
 0x215   : > { %v907_v19 = vadd.f32 %v906_v18, %v905_v17 }
 0x217   : > { %v908_v20 = vrot.slane %v907_v19, 1 }
 0x219   : > { %v2684_v21 = vadd.f32 %v908_v20, %v907_v19 }
 0x21b   : > { %1801 = vmatmul.mubr.msk.bf16.gmra.mrb[4].mxu0 %vm819_vm13, %v1996_v10  ;;  %vm960_vm1 = vcmp.eq.f32.partialorder %v2684_v21, 0.0  ;;  %vm1014_vm3 = vcmp.le.f32.partialorder %v2684_v21, 1.0  ;;  %vm1084_vm4 = vcmp.le.f32.partialorder %v2684_v21, 3.0  ;;  %vm979_vm5 = vcmp.le.f32.partialorder %v2684_v21, 0.0 }
 0x21c   : > { %1241 = vmatprep.mubr.f32.mxu0 %v2219_v12  ;;  %v1753_v22 = vsel %vm960_vm1, 1.0, %v2219_v12  ;;  %vm1049_vm6 = vcmp.le.f32.partialorder %v2684_v21, 2.0  ;;  %vm1310_vm7 = vcmp.le.f32.partialorder %v2684_v21, 5.0  ;;  %vm1380_vm8 = vcmp.le.f32.partialorder %v2684_v21, 7.0 }
 0x21d   : > { %vm1275_vm9 = vcmp.le.f32.partialorder %v2684_v21, 4.0  ;;  %v2698_v39 = vsel %vm1014_vm3, 1.0, %v2219_v12  ;;  %v2701_v28 = vsel %vm1084_vm4, 1.0, %v2219_v12  ;;  %v2705_v38 = vmul.f32 0.0, %v1753_v22 }
 0x21e   : > { %v963_v27 = vmul.f32 %v1753_v22, %v1752_v23  ;;  %v2708_v29 = vsel %vm979_vm5, 1.0, %v2219_v12  ;;  %v2711_v31 = vsel %vm1049_vm6, 1.0, %v2219_v12  ;;  %v2717_v50 = vsel %vm1310_vm7, 1.0, %v2219_v12 }
 0x21f   : > { %v2720_v32 = vsel %vm1380_vm8, 1.0, %v2219_v12  ;;  %v2723_v33 = vsel %vm1275_vm9, 1.0, %v2219_v12 }
 0x2e6   : > { %v2703_v25 = vpop.f32.mrb[0].mxu0 }
 0x2e7   : > { %vm913_vm10 = vcmp.eq.f32.partialorder %v2703_v25, 0.0  ;;  %v2714_v24 = vpop.f32.mrb[1].mxu0  ;;  %vm1000_vm2 = vcmp.eq.f32.partialorder %v2703_v25, 1.0  ;;  %vm1070_vm4 = vcmp.eq.f32.partialorder %v2703_v25, 3.0  ;;  %vm1035_vm7 = vcmp.eq.f32.partialorder %v2703_v25, 2.0 }
 0x2e8   : > { %v2726_v37 = vsel %vm913_vm10, %v2654_v1, 0.0  ;;  %vm911_vm11 = vcmp.eq.f32.partialorder %v2714_v24, 0.0  ;;  %v2729_v35 = vpop.f32.mrb[2].mxu0  ;;  %vm998_vm12 = vcmp.eq.f32.partialorder %v2714_v24, 1.0  ;;  %vm1068_vm14 = vcmp.eq.f32.partialorder %v2714_v24, 3.0 }
 0x2e9   : > { %v2735_v41 = vadd.f32 %v2705_v38, %v2726_v37  ;;  %v919_v42 = vsel %vm911_vm11, %v2648_v62, 0.0  ;;  %vm914_vm15 = vcmp.eq.f32.partialorder %v2729_v35, 0.0  ;;  %v2739_v36 = vpop.f32.mrb[3].mxu0  ;;  %v1006_v43 = vsel %vm998_vm12, %v2648_v62, 0.0 }
 0x2ea   : > { %v2742_v48 = vadd.f32 %v963_v27, %v919_v42  ;;  %v2745_v51 = vsel %vm914_vm15, %v2656_v2, 0.0  ;;  %vm912_vm0 = vcmp.eq.f32.partialorder %v2739_v36, 0.0  ;;  %vm999_vm1 = vcmp.eq.f32.partialorder %v2739_v36, 1.0 }
 0x2eb   : > { %v2752_v34 = vadd.f32 %v2705_v38, %v2745_v51  ;;  %v920_v45 = vsel %vm912_vm0, %v2650_v0, 0.0  ;;  %v1007_v54 = vsel %vm999_vm1, %v2650_v0, 0.0  ;;  %vm1069_vm3 = vcmp.eq.f32.partialorder %v2739_v36, 3.0 }
 0x2ec   : > { %v2758_v55 = vadd.f32 %v2705_v38, %v920_v45  ;;  %v1017_v56 = vmul.f32 %v2698_v39, %v2742_v48  ;;  %v1076_v57 = vsel %vm1068_vm14, %v2648_v62, 0.0  ;;  %v1077_v58 = vsel %vm1069_vm3, %v2650_v0, 0.0 }
 0x2ed   : > { %v1087_v59 = vmul.f32 %v2701_v28, %v2742_v48  ;;  %v982_v60 = vmul.f32 %v2708_v29, %v2742_v48  ;;  %vm1033_vm5 = vcmp.eq.f32.partialorder %v2714_v24, 2.0  ;;  %vm1034_vm6 = vcmp.eq.f32.partialorder %v2739_v36, 2.0 }
 0x2ee   : > { %v2773_v61 = vpop.f32.mrb[4].mxu0  ;;  %v1018_v40 = vmul.f32 %v2698_v39, %v2758_v55  ;;  %v1025_v49 = vadd.f32 %v1017_v56, %v1006_v43  ;;  %v1088_v47 = vmul.f32 %v2701_v28, %v2758_v55  ;;  %v983_v53 = vmul.f32 %v2708_v29, %v2758_v55 }
 0x2ef   : > { %vm917_vm8 = vcmp.eq.f32.partialorder %v2773_v61, 0.0  ;;  %v2783_v3 = vpop.f32.mrb[5].mxu0  ;;  %v1095_v5 = vadd.f32 %v1087_v59, %v1076_v57  ;;  %v990_v63 = vadd.f32 %v982_v60, %v919_v42  ;;  %v1041_v8 = vsel %vm1033_vm5, %v2648_v62, 0.0 }
 0x2f0   : > { %v2787_v9 = vsel %vm917_vm8, %v2666_v7, 0.0  ;;  %vm915_vm9 = vcmp.eq.f32.partialorder %v2783_v3, 0.0  ;;  %v2790_v10 = vpop.f32.mrb[6].mxu0  ;;  %v1026_v30 = vadd.f32 %v1018_v40, %v1007_v54  ;;  %v1096_v11 = vadd.f32 %v1088_v47, %v1077_v58 }
 0x2f1   : > { %v2794_v13 = vadd.f32 %v2705_v38, %v2787_v9  ;;  %v2797_v14 = vsel %vm915_vm9, %v2660_v4, 0.0  ;;  %vm918_vm10 = vcmp.eq.f32.partialorder %v2790_v10, 0.0  ;;  %v2800_v26 = vpop.f32.mrb[7].mxu0  ;;  %v991_v15 = vadd.f32 %v983_v53, %v920_v45 }
 0x2f2   : > { %v2804_v46 = vadd.f32 %v2705_v38, %v2797_v14  ;;  %v2807_v16 = vsel %vm918_vm10, %v2668_v52, 0.0  ;;  %vm916_vm11 = vcmp.eq.f32.partialorder %v2800_v26, 0.0  ;;  %v1804_v17 = vpack.c.bf16 %v1026_v30, %v1025_v49 }
 0x2f3   : > { %v2812_v18 = vadd.f32 %v2705_v38, %v2807_v16  ;;  %v2815_v19 = vsel %vm916_vm11, %v2662_v6, 0.0  ;;  %v1820_v20 = vpack.c.bf16 %v1096_v11, %v1095_v5  ;;  %v1806_v22 = vpack.c.bf16 %v991_v15, %v990_v63 }
 0x2f4   : > { %v2819_v23 = vadd.f32 %v2705_v38, %v2815_v19  ;;  %1805 = vmatprep.subr.bf16.mxu1 %v1804_v17  ;;  %v1042_v27 = vsel %vm1034_vm6, %v2650_v0, 0.0  ;;  %v1052_v42 = vmul.f32 %v2711_v31, %v2742_v48  ;;  %v1053_v43 = vmul.f32 %v2711_v31, %v2758_v55 }
 0x2f5   : > { %1821 = vmatprep.subr.bf16.mxu0 %v1820_v20  ;;  %1807 = vmatpush1.bf16.msra.mxu1 %v1806_v22  ;;  %vm1001_vm12 = vcmp.eq.f32.partialorder %v2729_v35, 1.0  ;;  %v1008_v38 = vsel %vm1000_vm2, %v2654_v1, 0.0  ;;  %v1019_v45 = vmul.f32 %v2698_v39, %v2735_v41  ;;  %v1020_v54 = vmul.f32 %v2698_v39, %v2752_v34 }
 0x2f6   : > { %v1060_v56 = vadd.f32 %v1052_v42, %v1041_v8  ;;  %v1061_v57 = vadd.f32 %v1053_v43, %v1042_v27  ;;  %v1009_v58 = vsel %vm1001_vm12, %v2656_v2, 0.0  ;;  %vm1071_vm14 = vcmp.eq.f32.partialorder %v2729_v35, 3.0 }
 0x2f7   : > { %v1027_v59 = vadd.f32 %v1019_v45, %v1008_v38  ;;  %v1028_v60 = vadd.f32 %v1020_v54, %v1009_v58  ;;  %v1078_v40 = vsel %vm1070_vm4, %v2654_v1, 0.0  ;;  %v1079_v49 = vsel %vm1071_vm14, %v2656_v2, 0.0 }
 0x2f8   : > { %v1822_v47 = vpack.c.bf16 %v1061_v57, %v1060_v56  ;;  %v1089_v53 = vmul.f32 %v2701_v28, %v2735_v41  ;;  %v1090_v5 = vmul.f32 %v2701_v28, %v2752_v34  ;;  %v984_v63 = vmul.f32 %v2708_v29, %v2735_v41 }
 0x2f9   : > { %vm1345_vm15 = vcmp.le.f32.partialorder %v2684_v21, 6.0  ;;  %v1808_v8 = vpack.c.bf16 %v1028_v60, %v1027_v59  ;;  %v985_v30 = vmul.f32 %v2708_v29, %v2752_v34  ;;  %vm1036_vm0 = vcmp.eq.f32.partialorder %v2729_v35, 2.0 }
 0x2fa   : > { %v1043_v11 = vsel %vm1035_vm7, %v2654_v1, 0.0  ;;  %1823 = vmatpush1.bf16.msra.mxu0 %v1822_v47  ;;  %v1097_v15 = vadd.f32 %v1089_v53, %v1078_v40  ;;  %v1098_v17 = vadd.f32 %v1090_v5, %v1079_v49  ;;  %v992_v20 = vadd.f32 %v984_v63, %v2726_v37 }
 0x2fb   : > { %v1044_v22 = vsel %vm1036_vm0, %v2656_v2, 0.0  ;;  %1809 = vmatprep.subr.bf16.mxu1 %v1808_v8  ;;  %v993_v27 = vadd.f32 %v985_v30, %v2745_v51  ;;  %v1054_v42 = vmul.f32 %v2711_v31, %v2735_v41  ;;  %v1055_v43 = vmul.f32 %v2711_v31, %v2752_v34 }
 0x2fc   : > { %vm1002_vm1 = vcmp.eq.f32.partialorder %v2783_v3, 1.0  ;;  %v1824_v38 = vpack.c.bf16 %v1098_v17, %v1097_v15  ;;  %vm1003_vm2 = vcmp.eq.f32.partialorder %v2800_v26, 1.0  ;;  %v1021_v37 = vmul.f32 %v2698_v39, %v2804_v46 }
 0x2fd   : > { %v1010_v45 = vsel %vm1002_vm1, %v2660_v4, 0.0  ;;  %v1810_v54 = vpack.c.bf16 %v993_v27, %v992_v20  ;;  %v1062_v56 = vadd.f32 %v1054_v42, %v1043_v11  ;;  %v1063_v57 = vadd.f32 %v1055_v43, %v1044_v22 }
 0x2fe   : > { %v1011_v51 = vsel %vm1003_vm2, %v2662_v6, 0.0  ;;  %1825 = vmatprep.subr.bf16.mxu0 %v1824_v38  ;;  %v1022_v58 = vmul.f32 %v2698_v39, %v2819_v23  ;;  %v1029_v59 = vadd.f32 %v1021_v37, %v1010_v45  ;;  %vm1072_vm3 = vcmp.eq.f32.partialorder %v2783_v3, 3.0 }
 0x2ff   : > { %vm1073_vm4 = vcmp.eq.f32.partialorder %v2800_v26, 3.0  ;;  %1811 = vmatpush1.bf16.msra.mxu1 %v1810_v54  ;;  %v1826_v60 = vpack.c.bf16 %v1063_v57, %v1062_v56  ;;  %v1080_v40 = vsel %vm1072_vm3, %v2660_v4, 0.0  ;;  %v1091_v47 = vmul.f32 %v2701_v28, %v2804_v46 }
 0x300   : > { %v1081_v49 = vsel %vm1073_vm4, %v2662_v6, 0.0  ;;  %v1030_v53 = vadd.f32 %v1022_v58, %v1011_v51  ;;  %v1092_v5 = vmul.f32 %v2701_v28, %v2819_v23  ;;  %v986_v63 = vmul.f32 %v2708_v29, %v2804_v46 }
 0x301   : > { %v987_v8 = vmul.f32 %v2708_v29, %v2819_v23  ;;  %1827 = vmatpush1.bf16.msra.mxu0 %v1826_v60  ;;  %v1099_v30 = vadd.f32 %v1091_v47, %v1080_v40  ;;  %vm1037_vm5 = vcmp.eq.f32.partialorder %v2783_v3, 2.0  ;;  %vm1038_vm6 = vcmp.eq.f32.partialorder %v2800_v26, 2.0 }
 0x302   : > { %v1056_v11 = vmul.f32 %v2711_v31, %v2804_v46  ;;  %v1812_v15 = vpack.c.bf16 %v1030_v53, %v1029_v59  ;;  %v1100_v17 = vadd.f32 %v1092_v5, %v1081_v49  ;;  %v994_v20 = vadd.f32 %v986_v63, %v2797_v14 }
 0x303   : > { %v995_v22 = vadd.f32 %v987_v8, %v2815_v19  ;;  %v1045_v27 = vsel %vm1037_vm5, %v2660_v4, 0.0  ;;  %v1057_v42 = vmul.f32 %v2711_v31, %v2819_v23  ;;  %vm1004_vm7 = vcmp.eq.f32.partialorder %v2773_v61, 1.0 }
 0x304   : > { %v2895_v43 = vsel %vm1345_vm15, 1.0, %v2219_v12  ;;  %1813 = vmatprep.subr.bf16.mxu1 %v1812_v15  ;;  %v1828_v38 = vpack.c.bf16 %v1100_v17, %v1099_v30  ;;  %v1046_v37 = vsel %vm1038_vm6, %v2662_v6, 0.0  ;;  %vm1005_vm8 = vcmp.eq.f32.partialorder %v2790_v10, 1.0 }
 0x305   : > { %v1814_v45 = vpack.c.bf16 %v995_v22, %v994_v20  ;;  %v1064_v14 = vadd.f32 %v1056_v11, %v1045_v27  ;;  %v1065_v19 = vadd.f32 %v1057_v42, %v1046_v37  ;;  %v1012_v54 = vsel %vm1004_vm7, %v2666_v7, 0.0 }
 0x306   : > { %v1023_v56 = vmul.f32 %v2698_v39, %v2794_v13  ;;  %1829 = vmatprep.subr.bf16.mxu0 %v1828_v38  ;;  %v1024_v21 = vmul.f32 %v2698_v39, %v2812_v18  ;;  %vm1074_vm9 = vcmp.eq.f32.partialorder %v2773_v61, 3.0  ;;  %vm1075_vm10 = vcmp.eq.f32.partialorder %v2790_v10, 3.0 }
 0x307   : > { %1815 = vmatpush1.bf16.msra.mxu1 %v1814_v45  ;;  %v1093_v57 = vmul.f32 %v2701_v28, %v2794_v13  ;;  %v1830_v51 = vpack.c.bf16 %v1065_v19, %v1064_v14  ;;  %v1013_v58 = vsel %vm1005_vm8, %v2668_v52, 0.0  ;;  %v1082_v60 = vsel %vm1074_vm9, %v2666_v7, 0.0 }
 0x308   : > { %v1031_v59 = vadd.f32 %v1023_v56, %v1012_v54  ;;  %v1032_v40 = vadd.f32 %v1024_v21, %v1013_v58  ;;  %v1083_v49 = vsel %vm1075_vm10, %v2668_v52, 0.0  ;;  %v1094_v47 = vmul.f32 %v2701_v28, %v2812_v18 }
 0x309   : > { %v988_v39 = vmul.f32 %v2708_v29, %v2794_v13  ;;  %1831 = vmatpush1.bf16.msra.mxu0 %v1830_v51  ;;  %v989_v53 = vmul.f32 %v2708_v29, %v2812_v18  ;;  %vm1039_vm11 = vcmp.eq.f32.partialorder %v2773_v61, 2.0  ;;  %vm1040_vm12 = vcmp.eq.f32.partialorder %v2790_v10, 2.0 }
 0x30a   : > { %v1058_v5 = vmul.f32 %v2711_v31, %v2794_v13  ;;  %v1816_v63 = vpack.c.bf16 %v1032_v40, %v1031_v59  ;;  %v1101_v8 = vadd.f32 %v1093_v57, %v1082_v60  ;;  %v1102_v30 = vadd.f32 %v1094_v47, %v1083_v49 }
 0x30b   : > { %v996_v11 = vadd.f32 %v988_v39, %v2787_v9  ;;  %v997_v28 = vadd.f32 %v989_v53, %v2807_v16  ;;  %v1047_v15 = vsel %vm1039_vm11, %v2666_v7, 0.0  ;;  %v1048_v17 = vsel %vm1040_vm12, %v2668_v52, 0.0 }
 0x30c   : > { %v1059_v29 = vmul.f32 %v2711_v31, %v2812_v18  ;;  %1817 = vmatprep.subr.bf16.mxu1 %v1816_v63  ;;  %v1832_v20 = vpack.c.bf16 %v1102_v30, %v1101_v8  ;;  %vm1294_vm14 = vcmp.eq.f32.partialorder %v2714_v24, 5.0  ;;  %vm1295_vm15 = vcmp.eq.f32.partialorder %v2739_v36, 5.0 }
 0x30d   : > { %v1313_v22 = vmul.f32 %v2717_v50, %v2742_v48  ;;  %v1818_v27 = vpack.c.bf16 %v997_v28, %v996_v11  ;;  %v1066_v9 = vadd.f32 %v1058_v5, %v1047_v15  ;;  %v1302_v16 = vsel %vm1294_vm14, %v2648_v62, 0.0 }
 0x30e   : > { %v1067_v42 = vadd.f32 %v1059_v29, %v1048_v17  ;;  %1833 = vmatprep.subr.bf16.mxu0 %v1832_v20  ;;  %v1303_v38 = vsel %vm1295_vm15, %v2650_v0, 0.0  ;;  %v1314_v31 = vmul.f32 %v2717_v50, %v2758_v55  ;;  %vm1364_vm0 = vcmp.eq.f32.partialorder %v2714_v24, 7.0 }
 0x30f   : > { %vm1365_vm1 = vcmp.eq.f32.partialorder %v2739_v36, 7.0  ;;  %1819 = vmatpush1.bf16.msra.mxu1 %v1818_v27  ;;  %v1321_v37 = vadd.f32 %v1313_v22, %v1302_v16  ;;  %v1372_v14 = vsel %vm1364_vm0, %v2648_v62, 0.0  ;;  %v1383_v19 = vmul.f32 %v2720_v32, %v2742_v48 }
 0x310   : > { %v1834_v45 = vpack.c.bf16 %v1067_v42, %v1066_v9  ;;  %v1322_v54 = vadd.f32 %v1314_v31, %v1303_v38  ;;  %v1384_v56 = vmul.f32 %v2720_v32, %v2758_v55  ;;  %vm1259_vm2 = vcmp.eq.f32.partialorder %v2714_v24, 4.0 }
 0x311   : > { %vm1260_vm3 = vcmp.eq.f32.partialorder %v2739_v36, 4.0  ;;  %v1373_v21 = vsel %vm1365_vm1, %v2650_v0, 0.0  ;;  %v1391_v57 = vadd.f32 %v1383_v19, %v1372_v14  ;;  %v1267_v51 = vsel %vm1259_vm2, %v2648_v62, 0.0 }
 0x312   : > { %1835 = vmatpush1.bf16.msra.mxu0 %v1834_v45  ;;  %v1278_v58 = vmul.f32 %v2723_v33, %v2742_v48  ;;  %v1836_v59 = vpack.c.bf16 %v1322_v54, %v1321_v37  ;;  %v1392_v60 = vadd.f32 %v1384_v56, %v1373_v21  ;;  %1758 = vmatmul.mubr.msk.f32.vlgmr.msra.gmra.mrb[0].mxu1 %vm819_vm13, %v2558_v44  ;;  %vm1329_vm4 = vcmp.eq.f32.partialorder %v2714_v24, 6.0 }
 0x313   : > { %v1279_v40 = vmul.f32 %v2723_v33, %v2758_v55  ;;  %v1268_v49 = vsel %vm1260_vm3, %v2650_v0, 0.0  ;;  %vm1330_vm5 = vcmp.eq.f32.partialorder %v2739_v36, 6.0  ;;  %v1348_v39 = vmul.f32 %v2895_v43, %v2742_v48  ;;  %1463 = vmatprep.mubr.f32.mxu1 %v2219_v12 }
 0x314   : > { %v1286_v47 = vadd.f32 %v1278_v58, %v1267_v51  ;;  %1837 = vmatprep.subr.bf16.mxu1 %v1836_v59  ;;  %v1852_v53 = vpack.c.bf16 %v1392_v60, %v1391_v57  ;;  %v1337_v63 = vsel %vm1329_vm4, %v2648_v62, 0.0  ;;  %v1349_v24 = vmul.f32 %v2895_v43, %v2758_v55 }
 0x315   : > { %1759 = vmatmul.mubr.msk.f32.vlgmr.msra.gmra.mrb[8].mxu0 %vm819_vm13, %v2558_v44  ;;  %v1287_v5 = vadd.f32 %v1279_v40, %v1268_v49  ;;  %v1338_v8 = vsel %vm1330_vm5, %v2650_v0, 0.0  ;;  %vm1296_vm6 = vcmp.eq.f32.partialorder %v2703_v25, 5.0  ;;  %vm1297_vm7 = vcmp.eq.f32.partialorder %v2729_v35, 5.0 }
 0x316   : > { %v1315_v36 = vmul.f32 %v2717_v50, %v2735_v41  ;;  %1534 = vmatprep.mubr.f32.mxu0 %v2219_v12  ;;  %1853 = vmatprep.subr.bf16.mxu0 %v1852_v53  ;;  %v1356_v44 = vadd.f32 %v1348_v39, %v1337_v63  ;;  %v1357_v30 = vadd.f32 %v1349_v24, %v1338_v8  ;;  %v1304_v62 = vsel %vm1296_vm6, %v2654_v1, 0.0 }
 0x317   : > { %v1838_v48 = vpack.c.bf16 %v1287_v5, %v1286_v47  ;;  %v1305_v11 = vsel %vm1297_vm7, %v2656_v2, 0.0  ;;  %v1316_v0 = vmul.f32 %v2717_v50, %v2752_v34  ;;  %vm1366_vm8 = vcmp.eq.f32.partialorder %v2703_v25, 7.0 }
 0x318   : > { %vm1367_vm9 = vcmp.eq.f32.partialorder %v2729_v35, 7.0  ;;  %v1854_v55 = vpack.c.bf16 %v1357_v30, %v1356_v44  ;;  %v1323_v28 = vadd.f32 %v1315_v36, %v1304_v62  ;;  %v1374_v12 = vsel %vm1366_vm8, %v2654_v1, 0.0 }
 0x319   : > { %1839 = vmatpush1.bf16.msra.mxu1 %v1838_v48  ;;  %v1385_v15 = vmul.f32 %v2720_v32, %v2735_v41  ;;  %v1324_v17 = vadd.f32 %v1316_v0, %v1305_v11  ;;  %v1386_v29 = vmul.f32 %v2720_v32, %v2752_v34  ;;  %vm1261_vm10 = vcmp.eq.f32.partialorder %v2703_v25, 4.0 }
 0x31a   : > { %vm1262_vm11 = vcmp.eq.f32.partialorder %v2729_v35, 4.0  ;;  %1855 = vmatpush1.bf16.msra.mxu0 %v1854_v55  ;;  %v1375_v20 = vsel %vm1367_vm9, %v2656_v2, 0.0  ;;  %v1269_v27 = vsel %vm1261_vm10, %v2654_v1, 0.0  ;;  %v1280_v9 = vmul.f32 %v2723_v33, %v2735_v41 }
 0x31b   : > { %v1393_v22 = vadd.f32 %v1385_v15, %v1374_v12  ;;  %v1840_v42 = vpack.c.bf16 %v1324_v17, %v1323_v28  ;;  %v1394_v16 = vadd.f32 %v1386_v29, %v1375_v20  ;;  %v1281_v38 = vmul.f32 %v2723_v33, %v2752_v34 }
 0x31c   : > { %vm1331_vm12 = vcmp.eq.f32.partialorder %v2703_v25, 6.0  ;;  %v1270_v31 = vsel %vm1262_vm11, %v2656_v2, 0.0  ;;  %v1288_v45 = vadd.f32 %v1280_v9, %v1269_v27  ;;  %vm1332_vm14 = vcmp.eq.f32.partialorder %v2729_v35, 6.0 }
 0x31d   : > { %v1350_v37 = vmul.f32 %v2895_v43, %v2735_v41  ;;  %1841 = vmatprep.subr.bf16.mxu1 %v1840_v42  ;;  %v1856_v14 = vpack.c.bf16 %v1394_v16, %v1393_v22  ;;  %v1289_v19 = vadd.f32 %v1281_v38, %v1270_v31  ;;  %v1339_v54 = vsel %vm1331_vm12, %v2654_v1, 0.0 }
 0x31e   : > { %v1351_v56 = vmul.f32 %v2895_v43, %v2752_v34  ;;  %v1340_v21 = vsel %vm1332_vm14, %v2656_v2, 0.0  ;;  %vm1298_vm15 = vcmp.eq.f32.partialorder %v2783_v3, 5.0  ;;  %vm1299_vm0 = vcmp.eq.f32.partialorder %v2800_v26, 5.0 }
 0x31f   : > { %v1317_v25 = vmul.f32 %v2717_v50, %v2804_v46  ;;  %1857 = vmatprep.subr.bf16.mxu0 %v1856_v14  ;;  %v1842_v35 = vpack.c.bf16 %v1289_v19, %v1288_v45  ;;  %v1358_v41 = vadd.f32 %v1350_v37, %v1339_v54  ;;  %v1306_v51 = vsel %vm1298_vm15, %v2660_v4, 0.0 }
 0x320   : > { %v1359_v57 = vadd.f32 %v1351_v56, %v1340_v21  ;;  %v1307_v1 = vsel %vm1299_vm0, %v2662_v6, 0.0  ;;  %v1318_v34 = vmul.f32 %v2717_v50, %v2819_v23  ;;  %vm1368_vm1 = vcmp.eq.f32.partialorder %v2783_v3, 7.0 }
 0x321   : > { %vm1369_vm2 = vcmp.eq.f32.partialorder %v2800_v26, 7.0  ;;  %1843 = vmatpush1.bf16.msra.mxu1 %v1842_v35  ;;  %v1325_v58 = vadd.f32 %v1317_v25, %v1306_v51  ;;  %v1376_v59 = vsel %vm1368_vm1, %v2660_v4, 0.0  ;;  %v1387_v60 = vmul.f32 %v2720_v32, %v2804_v46  ;;  %v342_v35 = vld [vmem:[%s2484_s21] sm:$0x7f] }
 0x322   : > { %v1858_v2 = vpack.c.bf16 %v1359_v57, %v1358_v41  ;;  %v1326_v40 = vadd.f32 %v1318_v34, %v1307_v1  ;;  %v1388_v49 = vmul.f32 %v2720_v32, %v2819_v23  ;;  %vm1263_vm3 = vcmp.eq.f32.partialorder %v2783_v3, 4.0 }
 0x323   : > { %vm1264_vm4 = vcmp.eq.f32.partialorder %v2800_v26, 4.0  ;;  %v1377_v47 = vsel %vm1369_vm2, %v2662_v6, 0.0  ;;  %v1395_v39 = vadd.f32 %v1387_v60, %v1376_v59  ;;  %v1271_v53 = vsel %vm1263_vm3, %v2660_v4, 0.0 }
 0x324   : > { %1859 = vmatpush1.bf16.msra.mxu0 %v1858_v2  ;;  %v1282_v5 = vmul.f32 %v2723_v33, %v2804_v46  ;;  %v1844_v63 = vpack.c.bf16 %v1326_v40, %v1325_v58  ;;  %v1396_v24 = vadd.f32 %v1388_v49, %v1377_v47  ;;  %v1283_v8 = vmul.f32 %v2723_v33, %v2819_v23 }
 0x325   : > { %vm1333_vm5 = vcmp.eq.f32.partialorder %v2783_v3, 6.0  ;;  %v1272_v36 = vsel %vm1264_vm4, %v2662_v6, 0.0  ;;  %vm1334_vm6 = vcmp.eq.f32.partialorder %v2800_v26, 6.0  ;;  %v1352_v44 = vmul.f32 %v2895_v43, %v2804_v46 }
 0x326   : > { %v1290_v48 = vadd.f32 %v1282_v5, %v1271_v53  ;;  %1845 = vmatprep.subr.bf16.mxu1 %v1844_v63  ;;  %v1860_v30 = vpack.c.bf16 %v1396_v24, %v1395_v39  ;;  %v1291_v62 = vadd.f32 %v1283_v8, %v1272_v36  ;;  %v1341_v11 = vsel %vm1333_vm5, %v2660_v4, 0.0 }
 0x327   : > { %v1353_v0 = vmul.f32 %v2895_v43, %v2819_v23  ;;  %v1342_v55 = vsel %vm1334_vm6, %v2662_v6, 0.0  ;;  %vm1300_vm7 = vcmp.eq.f32.partialorder %v2773_v61, 5.0  ;;  %vm1301_vm8 = vcmp.eq.f32.partialorder %v2790_v10, 5.0 }
 0x328   : > { %v1319_v3 = vmul.f32 %v2717_v50, %v2794_v13  ;;  %1861 = vmatprep.subr.bf16.mxu0 %v1860_v30  ;;  %v1846_v26 = vpack.c.bf16 %v1291_v62, %v1290_v48  ;;  %v1360_v46 = vadd.f32 %v1352_v44, %v1341_v11  ;;  %v1308_v12 = vsel %vm1300_vm7, %v2666_v7, 0.0 }
 0x329   : > { %v1361_v28 = vadd.f32 %v1353_v0, %v1342_v55  ;;  %v1309_v4 = vsel %vm1301_vm8, %v2668_v52, 0.0  ;;  %v1320_v23 = vmul.f32 %v2717_v50, %v2812_v18  ;;  %vm1370_vm9 = vcmp.eq.f32.partialorder %v2773_v61, 7.0 }
 0x32a   : > { %vm1371_vm10 = vcmp.eq.f32.partialorder %v2790_v10, 7.0  ;;  %1847 = vmatpush1.bf16.msra.mxu1 %v1846_v26  ;;  %v1327_v15 = vadd.f32 %v1319_v3, %v1308_v12  ;;  %v1378_v17 = vsel %vm1370_vm9, %v2666_v7, 0.0  ;;  %v1389_v29 = vmul.f32 %v2720_v32, %v2794_v13 }
 0x32b   : > { %v1862_v6 = vpack.c.bf16 %v1361_v28, %v1360_v46  ;;  %v1328_v20 = vadd.f32 %v1320_v23, %v1309_v4  ;;  %v1390_v22 = vmul.f32 %v2720_v32, %v2812_v18  ;;  %vm1265_vm11 = vcmp.eq.f32.partialorder %v2773_v61, 4.0 }
 0x32c   : > { %vm1266_vm12 = vcmp.eq.f32.partialorder %v2790_v10, 4.0  ;;  %v1379_v50 = vsel %vm1371_vm10, %v2668_v52, 0.0  ;;  %v1397_v27 = vadd.f32 %v1389_v29, %v1378_v17  ;;  %v1284_v9 = vmul.f32 %v2723_v33, %v2794_v13 }
 0x32d   : > { %1863 = vmatpush1.bf16.msra.mxu0 %v1862_v6  ;;  %v1848_v42 = vpack.c.bf16 %v1328_v20, %v1327_v15  ;;  %v1398_v16 = vadd.f32 %v1390_v22, %v1379_v50  ;;  %v1285_v38 = vmul.f32 %v2723_v33, %v2812_v18  ;;  %vm1335_vm14 = vcmp.eq.f32.partialorder %v2773_v61, 6.0 }
 0x32e   : > { %v1273_v32 = vsel %vm1265_vm11, %v2666_v7, 0.0  ;;  %v1274_v31 = vsel %vm1266_vm12, %v2668_v52, 0.0  ;;  %vm1336_vm15 = vcmp.eq.f32.partialorder %v2790_v10, 6.0  ;;  %v1354_v45 = vmul.f32 %v2895_v43, %v2794_v13  ;;  %v1997_v13 = vld [vmem:[%s2487_s10] sm:$0x7f] }
 0x32f   : > { %1849 = vmatprep.subr.bf16.mxu1 %v1848_v42  ;;  %v1864_v37 = vpack.c.bf16 %v1398_v16, %v1397_v27  ;;  %v1292_v14 = vadd.f32 %v1284_v9, %v1273_v32  ;;  %v1293_v19 = vadd.f32 %v1285_v38, %v1274_v31  ;;  %v1355_v33 = vmul.f32 %v2895_v43, %v2812_v18 }
 0x330   : > { %v1343_v61 = vsel %vm1335_vm14, %v2666_v7, 0.0  ;;  %v1344_v54 = vsel %vm1336_vm15, %v2668_v52, 0.0 }
 0x331   : > { %1865 = vmatprep.subr.bf16.mxu0 %v1864_v37  ;;  %v1850_v56 = vpack.c.bf16 %v1293_v19, %v1292_v14  ;;  %v1362_v10 = vadd.f32 %v1354_v45, %v1343_v61  ;;  %v1363_v21 = vadd.f32 %v1355_v33, %v1344_v54 }
 0x333   : > { %1851 = vmatpush1.bf16.msra.mxu1 %v1850_v56  ;;  %v1866_v25 = vpack.c.bf16 %v1363_v21, %v1362_v10 }
 0x335   : > { %1867 = vmatpush1.bf16.msra.mxu0 %v1866_v25 }
 0x336   : > { %1767 = vmatmul.mubr.msk.f32.vlgmr.msra.gmra.mrb[2].mxu1 %vm819_vm13, %v1997_v13 }
 0x338   : > { %1768 = vmatmul.mubr.msk.f32.vlgmr.msra.gmra.mrb[10].mxu0 %vm819_vm13, %v1997_v13 }
 0x3e5   : > { %v1172_v18 = vpop.f32.mrb[0].mxu1 }
 0x3e6   : > { %v1248_v43 = vsub.f32 %v1172_v18, %v342_v35  ;;  %v1174_v7 = vpop.f32.mrb[1].mxu1 }
 0x3e7   : > { %v1250_v52 = vsub.f32 %v1174_v7, %v342_v35 }
 0x3e8   : > { %v1243_v41 = vpop.f32.mrb[8].mxu0  ;;  %1249 = vst [vmem:[%s322_s12] sm:$0x7f] %v1248_v43 }
 0x3e9   : > { %v1253_v57 = vsub.f32 %v1243_v41, %v342_v35  ;;  %v1245_v51 = vpop.f32.mrb[9].mxu0  ;;  %1760 = vst [vmem:[%s322_s12 + $0x8] sm:$0x7f] %v1250_v52 }
 0x3ea   : > { %v1256_v1 = vsub.f32 %v1245_v51, %v342_v35 }
 0x3eb   : > { %1761 = vst [vmem:[%s322_s12 + $0x10] sm:$0x7f] %v1253_v57 }
 0x3ec   : > { %1762 = vst [vmem:[%s322_s12 + $0x18] sm:$0x7f] %v1256_v1 }
 0x409   : > { %v1465_v34 = vpop.f32.mrb[2].mxu1 }
 0x40a   : > { %v1541_v2 = vsub.f32 %v1465_v34, %v342_v35  ;;  %v1467_v58 = vpop.f32.mrb[3].mxu1 }
 0x40b   : > { %v1536_v59 = vpop.f32.mrb[10].mxu0  ;;  %v1544_v60 = vsub.f32 %v1467_v58, %v342_v35 }
 0x40c   : > { %1769 = vst [vmem:[%s322_s12 + $0x20] sm:$0x7f] %v1541_v2  ;;  %v1547_v40 = vsub.f32 %v1536_v59, %v342_v35  ;;  %v1538_v49 = vpop.f32.mrb[11].mxu0 }
 0x40d   : > { %1770 = vst [vmem:[%s322_s12 + $0x28] sm:$0x7f] %v1544_v60  ;;  %v1550_v47 = vsub.f32 %v1538_v49, %v342_v35 }
 0x40e   : > { %1771 = vst [vmem:[%s322_s12 + $0x30] sm:$0x7f] %v1547_v40 }
 0x40f   : > { %1772 = vst [vmem:[%s322_s12 + $0x38] sm:$0x7f] %v1550_v47 }
 0x410   : > { %2129 = shalt.err (!%p2126_p12)
}
 0x411   : > { %s2130_s17 = scalar_lea.hbm %s3072_s28, 1024  ;;  %s2134_s6 = scalar_lea.hbm %s3125_s4, 2048 }
 0x412   : > { %p2131_p0 = scmp.ne.s32.totalorder %s3072_s28, %s2130_s17  ;;  %p2135_p11 = scmp.lt.u32.totalorder %s3072_s28, %s3125_s4 }
 0x413   : > { %p2136_p8 = scmp.lt.u32.totalorder %s2134_s6, %s2130_s17  ;;  %p2138_p5 = scmp.lt.u32.totalorder %s2130_s17, %s3072_s28 }
 0x414   : > { %p2132_p2 = pnand %p2131_p0, %p3164_p10 }
 0x415   : > { %p2137_p7 = por %p2136_p8, %p2135_p11 }
 0x416   : > { %p2133_p1 = pneg %p2132_p2 }
 0x417   : > { %p2139_p13 = por %p2138_p5, %p2137_p7 }
 0x419   : > { %p2140_p3 = pnand %p2139_p13, %p2133_p1 }
 0x41b   : > { %2143 = shalt.err (!%p2140_p3)
}
 0x41c   : > { %s2221_s21 = smov 128   ;;  %s2222_s30 = smov 8  }
 0x41d   : > { %1878 = dma.vmem_to_hbm [thread:$0]  (%p3164_p10), %s3067_s23, 1024, %s3072_s28, %s1554_s18, %s2221_s21, %s2221_s21, %s2222_s30  }
 0x41e PF: > { %s3165_s10 = sld [smem:[#allocation16_spill]]  ;;  %s1583_s13 = sand.u32 1, %s2186_s15  }
 0x41f   : > { %p3166_p4 = scmp.ne.s32.totalorder %s3152_s8, 0  ;;  %s1584_s12 = scalar_lea.sflag [#allocation4], %s1583_s13 }
 0x424   : > { %p3167_p9 = scmp.ge.s32.totalorder %s3165_s10, 2 }
 0x426   : > { %p1895_p6 = pnand %p3167_p9, %p3166_p4 }
 0x428   : > { %2181 = dma.done.wait (!%p1895_p6), %s1584_s12, 1024  }
 0x429   : > { %2183 = vsyncadd (!%p1895_p6), %s1584_s12, 4294966272  ;;  %s24_s20 = sadd.s32 1, %s3165_s10   ;;  %s3168_s9 = sld [smem:[#allocation15_spill]] }
 0x42a   : > { %p21_p12 = scmp.ge.s32.totalorder %s24_s20, 4   ;;  %s3169_s17 = sld [smem:[#allocation18_spill]] }
 0x42b   : > { %s3170_s5 = sld [smem:[#allocation17_spill]]  ;;  %s3171_s15 = smov %s2190_s16 }
 0x42c   : > { %s3173_s18 = smov %s2202_s19  ;;  %23 = sbr.rel (!%p21_p12) target bundleno = 11 (0xb), region = 117 }
 0x42f   : > { %s3172_s16 = smov %s3168_s9 }
 0x431   : > { %s3174_s19 = smov %s3170_s5 }
 0x433   :  { %1589 = vsyncpa [#allocation3], 1 }
 0x434   :  { %1591 = vsyncpa [#allocation3 + $0x1], 1 }
 0x435   :  { %1592 = vsyncpa [#allocation6], 1 }
 0x436   :  { %1594 = vsyncpa [#allocation6 + $0x1], 1 }
 0x437   :  { %1595 = vsyncpa [#allocation9], 1 }
 0x438   :  { %1597 = vsyncpa [#allocation9 + $0x1], 1 }
 0x439   :  { %1598 = vsyncpa [#allocation4], 1 }
 0x43a   :  { %1600 = vsyncpa [#allocation4 + $0x1], 1 }

</bundles_post_ra>
